<compile_context>
chip_gen: v6e
topology: v6e:2x2x1
jax: 0.10.0
libtpu: 0.0.40
codegen_flags: <defaults>
</compile_context>

<pallas_src>
import functools

import jax
import jax.numpy as jnp
from jax.experimental import pallas as pl
from jax.experimental.pallas import tpu as pltpu

# ---- hyperparameters (channels must be divisible by 32 for GroupNorm) ----
NUM_LAYERS = 2
CHANNELS = 64
NUM_HEADS = 2
HEAD_FEATURES = 32
MULTIPLIER = 2
NUM_GROUPS = 32
GROUP_SIZE = CHANNELS // NUM_GROUPS
GN_EPS = 1e-6
LN_EPS = 1e-5

BATCH = 2
SEQ = 16

HEAD_DIM_TOTAL = NUM_HEADS * HEAD_FEATURES          # H*D
QKV_WIDTH = 3 * HEAD_DIM_TOTAL                       # 3*H*D (width of the bias table)
FF_DIM = CHANNELS * MULTIPLIER


def _gelu(x):
    # TODO(synk): nn.GELU() defaults to the exact erf formulation; using the tanh
    # approximation since erf lowering inside Mosaic is not guaranteed (~1e-3 dev).
    c = 0.7978845608028654  # sqrt(2/pi)
    return 0.5 * x * (1.0 + jnp.tanh(c * (x + 0.044715 * x * x * x)))


def transformer1d_kernel(
    x_ref,        # (n, C)        flattened activations (batches are contiguous T-row blocks)
    bmask_ref,    # (n, n)        1.0 if rows share a batch else 0.0
    sq_ref,       # (3+L, C, C)   [gn_pair, w_in, w_out, wo_0, ..., wo_{L-1}]
    wqkv_ref,     # (L, C, 3*H*D) fused QKV weight, LN affines pre-folded, cols [q | k | v]
    w1_ref,       # (L, C, M)
    w2_ref,       # (L, M, C)
    vec_ref,      # (4+4L, 3*H*D) padded bias/scale table (see pack_params for row layout)
    o_ref,        # (n, C)
    *, seq_len,
):
    f32 = jnp.float32
    x = x_ref[...].astype(f32)                       # (n, C)
    n, c = x.shape
    d = HEAD_FEATURES
    hd = HEAD_DIM_TOTAL
    scale = d ** (-0.5)

    bmask = bmask_ref[...]                           # (n, n)
    gn_pair = sq_ref[0]                              # (C, C) group-membership (0/1)

    def vrow(r, w=CHANNELS):                         # one (1, w) row of the packed bias table
        return vec_ref[r:r + 1, :w]

    # ---------- GroupNorm(num_groups=32, eps=1e-6, affine), per batch ----------
    # Per-(batch, group) statistics via two matmuls each (MXU is otherwise idle):
    #   batch-sum = bmask @ x ;  group-mean = (batch-sum @ gn_pair) / (T*group_size)
    inv_cnt = 1.0 / float(seq_len * GROUP_SIZE)
    bsum = jnp.dot(bmask, x, preferred_element_type=f32)                  # (n, C)
    mean = jnp.dot(bsum, gn_pair, preferred_element_type=f32) * inv_cnt   # (n, C)
    dev = x - mean
    bsq = jnp.dot(bmask, dev * dev, preferred_element_type=f32)
    var = jnp.dot(bsq, gn_pair, preferred_element_type=f32) * inv_cnt
    xn = dev * jax.lax.rsqrt(var + GN_EPS) * vrow(0) + vrow(1)            # gamma, beta

    # ---------- to_in Conv1d(kernel_size=1) == per-position linear ----------
    h = jnp.dot(xn, sq_ref[1], preferred_element_type=f32) + vrow(2)      # (n, C)

    # additive block-diagonal attention bias: 0 within a batch, -1e30 across batches
    attn_bias = (bmask - 1.0) * 1e30                                      # (n, n)

    # ---------- transformer blocks (static unroll over layers) ----------
    for l in range(NUM_LAYERS):
        base = 4 + 4 * l
        # --- self-attention; the two pre-LayerNorm affines are folded into wqkv/bqkv ---
        mu = jnp.mean(h, axis=-1, keepdims=True)
        dh = h - mu
        xhat = dh * jax.lax.rsqrt(jnp.mean(dh * dh, axis=-1, keepdims=True) + LN_EPS)
        qkv = (jnp.dot(xhat, wqkv_ref[l], preferred_element_type=f32)
               + vrow(base, 3 * hd))                                      # (n, 3*H*D)

        outs = []
        for hh in range(NUM_HEADS):   # H=2, fully unrolled; all matmuls stay 2-D
            qh = qkv[:, hh * d:(hh + 1) * d]                              # (n, D)
            kh = qkv[:, hd + hh * d:hd + (hh + 1) * d]                    # (n, D)
            vh = qkv[:, 2 * hd + hh * d:2 * hd + (hh + 1) * d]            # (n, D)
            s = jnp.dot(qh, kh.T, preferred_element_type=f32) * scale + attn_bias
            s = s - jnp.max(s, axis=-1, keepdims=True)
            p = jnp.exp(s)
            p = p / jnp.sum(p, axis=-1, keepdims=True)    # exact divide (fp32 parity)
            outs.append(jnp.dot(p, vh, preferred_element_type=f32))       # (n, D)
        ocat = outs[0] if NUM_HEADS == 1 else jnp.concatenate(outs, axis=-1)  # (n, H*D)
        # head concat folded into to_out: one (n,H*D)@(H*D,C) matmul + bias
        attn = jnp.dot(ocat, sq_ref[3 + l], preferred_element_type=f32) + vrow(base + 1)
        h = h + attn                                                      # residual

        # --- feed-forward: Linear -> GELU -> Linear, residual (no pre-norm in reference) ---
        mid = jnp.dot(h, w1_ref[l], preferred_element_type=f32) + vrow(base + 2, FF_DIM)
        mid = _gelu(mid)
        h = h + jnp.dot(mid, w2_ref[l], preferred_element_type=f32) + vrow(base + 3)

    # ---------- to_out Conv1d(kernel_size=1) ----------
    y = jnp.dot(h, sq_ref[2], preferred_element_type=f32) + vrow(3)
    o_ref[...] = y.astype(o_ref.dtype)


def _cost_estimate(n, c, args):
    m = FF_DIM
    hd = HEAD_DIM_TOTAL
    d = HEAD_FEATURES
    flops = 2 * n * n * c * 2                # GroupNorm batch-sum matmuls
    flops += 2 * n * c * c * 2               # GroupNorm group-mean matmuls
    flops += 2 * n * c * c * 2               # to_in + to_out
    flops += NUM_LAYERS * (
        2 * n * c * (3 * hd)                 # fused QKV
        + NUM_HEADS * (2 * n * n * d) * 2    # scores + P@V
        + 2 * n * hd * c                     # attention out projection
        + 2 * n * c * m * 2)                 # FFN
    transcendentals = NUM_LAYERS * (NUM_HEADS * n * n + n * m + 2 * n) + 2 * n
    bytes_accessed = sum(int(a.size) * 4 for a in args) + n * c * 4
    return pl.CostEstimate(flops=int(flops), transcendentals=int(transcendentals),
                           bytes_accessed=int(bytes_accessed))


def transformer1d_forward(x, packed):
    """x: (B, C, T) float32 -> (B, C, T) float32."""
    b, c, t = x.shape
    n = b * t
    # NOTE: these transposes bracket the kernel but touch only ~8 KiB here;
    # keeping C on the 128-lane axis inside the kernel is the right trade.
    x_flat = jnp.transpose(x, (0, 2, 1)).reshape(n, c)                    # (B*T, C)

    # block-diagonal batch-membership matrix: drives GroupNorm row-sums (matmul)
    # and the additive attention mask inside the kernel.
    row = jnp.arange(n, dtype=jnp.int32) // t
    bmask = (row[:, None] == row[None, :]).astype(jnp.float32)            # (n, n)

    args = (x_flat, bmask, packed["sq"], packed["wqkv"],
            packed["w1"], packed["w2"], packed["vec"])

    # Single invocation (no grid): the whole problem (<1 MiB) lives in VMEM; a
    # per-batch grid split was measured-overhead-bound even on multi-TC chips.
    vmem = pl.BlockSpec(memory_space=pltpu.MemorySpace.VMEM)
    out = pl.pallas_call(
        functools.partial(transformer1d_kernel, seq_len=t),
        out_shape=jax.ShapeDtypeStruct((n, c), jnp.float32),
        in_specs=[vmem] * len(args),
        out_specs=vmem,
        cost_estimate=_cost_estimate(n, c, args),
    )(*args)

    return jnp.transpose(out.reshape(b, t, c), (0, 2, 1))                 # back to (B, C, T)


def init_params(key):
    """Canonical parameters (already in x @ W orientation)."""
    c, hd, m, L = CHANNELS, HEAD_DIM_TOTAL, FF_DIM, NUM_LAYERS
    ks = iter(jax.random.split(key, 32))

    def nrm(shape, s=0.05):
        return jax.random.normal(next(ks), shape, jnp.float32) * s

    return dict(
        gn_gamma=1.0 + nrm((c,)), gn_beta=nrm((c,)),
        w_in=nrm((c, c)), b_in=nrm((c,)),
        w_out=nrm((c, c)), b_out=nrm((c,)),
        ln_g=1.0 + nrm((L, c)), ln_b=nrm((L, c)),        # Attention.norm (q path)
        lnc_g=1.0 + nrm((L, c)), lnc_b=nrm((L, c)),      # Attention.norm_context (k/v path)
        wq=nrm((L, c, hd)),                              # to_q.weight.T   (no bias)
        wkv=nrm((L, c, 2 * hd)),                         # to_kv.weight.T  (no bias), cols [k | v]
        wo=nrm((L, hd, c)), bo=nrm((L, c)),              # to_out
        w1=nrm((L, c, m)), b1=nrm((L, m)),               # FFN
        w2=nrm((L, m, c)), b2=nrm((L, c)),
    )


def pack_params(p):
    """Repack canonical params into the kernel's consolidated buffers."""
    c, hd, L = CHANNELS, HEAD_DIM_TOTAL, NUM_LAYERS
    W = QKV_WIDTH
    assert hd == c, "sq-pack assumes num_heads * head_features == channels"

    # GroupNorm group-membership matrix: P[i, j] = 1 iff channels i, j share a group.
    idx = jnp.arange(c)
    gn_pair = (idx[:, None] // GROUP_SIZE == idx[None, :] // GROUP_SIZE).astype(jnp.float32)

    # Fold the two pre-attention LayerNorm affines into the fused QKV weight/bias:
    #   q = (xhat*g + b) @ Wq = xhat @ (diag(g) Wq) + b @ Wq   (to_q/to_kv have no bias)
    wqkv, bqkv = [], []
    for l in range(L):
        wq_f = p["ln_g"][l][:, None] * p["wq"][l]                         # (C, HD)
        wkv_f = p["lnc_g"][l][:, None] * p["wkv"][l]                      # (C, 2*HD)
        wqkv.append(jnp.concatenate([wq_f, wkv_f], axis=1))               # (C, 3*HD): [q | k | v]
        bqkv.append(jnp.concatenate([p["ln_b"][l] @ p["wq"][l],
                                     p["lnc_b"][l] @ p["wkv"][l]]))       # (3*HD,)
    wqkv = jnp.stack(wqkv)                                                # (L, C, 3*HD)
    bqkv = jnp.stack(bqkv)                                                # (L, 3*HD)

    # All (C, C)-shaped matrices in one stack (one DMA descriptor).
    sq = jnp.stack([gn_pair, p["w_in"], p["w_out"]] + [p["wo"][l] for l in range(L)])

    # Single padded bias/scale table, width 3*H*D.
    def row(v):
        return jnp.zeros((1, W), jnp.float32).at[0, :v.shape[0]].set(v)

    rows = [row(p["gn_gamma"]), row(p["gn_beta"]), row(p["b_in"]), row(p["b_out"])]
    for l in range(L):
        rows += [row(bqkv[l]), row(p["bo"][l]), row(p["b1"][l]), row(p["b2"][l])]
    vec = jnp.concatenate(rows, axis=0)                                   # (4+4L, 3*H*D)

    return dict(sq=sq, wqkv=wqkv, w1=p["w1"], w2=p["w2"], vec=vec)


if __name__ == "__main__":
    key = jax.random.PRNGKey(0)
    k_x, k_p = jax.random.split(key)
    x = jax.random.normal(k_x, (BATCH, CHANNELS, SEQ), jnp.float32)
    packed = pack_params(init_params(k_p))

    y = jax.jit(transformer1d_forward)(x, packed)
    jax.block_until_ready(y)
    assert y.shape == (BATCH, CHANNELS, SEQ)
    assert bool(jnp.all(jnp.isfinite(y)))
    print("KERNEL_OK")
</pallas_src>

<mosaic_0001>
module attributes {stable_mosaic.version = 11 : i64} {
  func.func @transformer1d_kernel(%arg0: memref<32x64xf32, #tpu.memory_space<vmem>>, %arg1: memref<32x32xf32, #tpu.memory_space<vmem>>, %arg2: memref<5x64x64xf32, #tpu.memory_space<vmem>>, %arg3: memref<2x64x192xf32, #tpu.memory_space<vmem>>, %arg4: memref<2x64x128xf32, #tpu.memory_space<vmem>>, %arg5: memref<2x128x64xf32, #tpu.memory_space<vmem>>, %arg6: memref<12x192xf32, #tpu.memory_space<vmem>>, %arg7: memref<32x64xf32, #tpu.memory_space<vmem>>) attributes {dimension_semantics = [], scalar_prefetch = 0 : i64, scratch_operands = 0 : i64, tpu.core_type = #tpu.core_type<tc>} {
    %c0 = arith.constant 0 : index
    %c0_0 = arith.constant 0 : index
    %0 = vector.load %arg0[%c0, %c0_0] : memref<32x64xf32, #tpu.memory_space<vmem>>, vector<32x64xf32>
    %c0_1 = arith.constant 0 : index
    %c0_2 = arith.constant 0 : index
    %1 = vector.load %arg1[%c0_1, %c0_2] : memref<32x32xf32, #tpu.memory_space<vmem>>, vector<32x32xf32>
    %c0_3 = arith.constant 0 : index
    %c0_4 = arith.constant 0 : index
    %c0_5 = arith.constant 0 : index
    %2 = vector.load %arg2[%c0_3, %c0_4, %c0_5] : memref<5x64x64xf32, #tpu.memory_space<vmem>>, vector<1x64x64xf32>
    %3 = vector.shape_cast %2 : vector<1x64x64xf32> to vector<64x64xf32>
    %cst = arith.constant dense<0.000000e+00> : vector<32x64xf32>
    %4 = tpu.matmul %1, %0, %cst {dimension_numbers = #tpu.dot_dimension_numbers<[1], [0], [0], [1], [0, 0, 1, 1], [], []>} : vector<32x32xf32>, vector<32x64xf32>, vector<32x64xf32> -> vector<32x64xf32>
    %cst_6 = arith.constant dense<0.000000e+00> : vector<32x64xf32>
    %5 = tpu.matmul %4, %3, %cst_6 {dimension_numbers = #tpu.dot_dimension_numbers<[1], [0], [0], [1], [0, 0, 1, 1], [], []>} : vector<32x64xf32>, vector<64x64xf32>, vector<32x64xf32> -> vector<32x64xf32>
    %cst_7 = arith.constant 3.125000e-02 : f32
    %6 = vector.broadcast %cst_7 : f32 to vector<32x64xf32>
    %7 = arith.mulf %5, %6 : vector<32x64xf32>
    %8 = arith.subf %0, %7 : vector<32x64xf32>
    %9 = arith.mulf %8, %8 : vector<32x64xf32>
    %cst_8 = arith.constant dense<0.000000e+00> : vector<32x64xf32>
    %10 = tpu.matmul %1, %9, %cst_8 {dimension_numbers = #tpu.dot_dimension_numbers<[1], [0], [0], [1], [0, 0, 1, 1], [], []>} : vector<32x32xf32>, vector<32x64xf32>, vector<32x64xf32> -> vector<32x64xf32>
    %cst_9 = arith.constant dense<0.000000e+00> : vector<32x64xf32>
    %11 = tpu.matmul %10, %3, %cst_9 {dimension_numbers = #tpu.dot_dimension_numbers<[1], [0], [0], [1], [0, 0, 1, 1], [], []>} : vector<32x64xf32>, vector<64x64xf32>, vector<32x64xf32> -> vector<32x64xf32>
    %cst_10 = arith.constant 3.125000e-02 : f32
    %12 = vector.broadcast %cst_10 : f32 to vector<32x64xf32>
    %13 = arith.mulf %11, %12 : vector<32x64xf32>
    %cst_11 = arith.constant 9.99999997E-7 : f32
    %14 = vector.broadcast %cst_11 : f32 to vector<32x64xf32>
    %15 = arith.addf %13, %14 : vector<32x64xf32>
    %16 = math.rsqrt %15 : vector<32x64xf32>
    %17 = arith.mulf %8, %16 : vector<32x64xf32>
    %c0_12 = arith.constant 0 : index
    %c0_13 = arith.constant 0 : index
    %18 = vector.load %arg6[%c0_12, %c0_13] : memref<12x192xf32, #tpu.memory_space<vmem>>, vector<1x64xf32>
    %19 = vector.broadcast %18 : vector<1x64xf32> to vector<32x64xf32>
    %20 = arith.mulf %17, %19 : vector<32x64xf32>
    %c1 = arith.constant 1 : index
    %c0_14 = arith.constant 0 : index
    %21 = vector.load %arg6[%c1, %c0_14] : memref<12x192xf32, #tpu.memory_space<vmem>>, vector<1x64xf32>
    %22 = vector.broadcast %21 : vector<1x64xf32> to vector<32x64xf32>
    %23 = arith.addf %20, %22 : vector<32x64xf32>
    %c1_15 = arith.constant 1 : index
    %c0_16 = arith.constant 0 : index
    %c0_17 = arith.constant 0 : index
    %24 = vector.load %arg2[%c1_15, %c0_16, %c0_17] : memref<5x64x64xf32, #tpu.memory_space<vmem>>, vector<1x64x64xf32>
    %25 = vector.shape_cast %24 : vector<1x64x64xf32> to vector<64x64xf32>
    %cst_18 = arith.constant dense<0.000000e+00> : vector<32x64xf32>
    %26 = tpu.matmul %23, %25, %cst_18 {dimension_numbers = #tpu.dot_dimension_numbers<[1], [0], [0], [1], [0, 0, 1, 1], [], []>} : vector<32x64xf32>, vector<64x64xf32>, vector<32x64xf32> -> vector<32x64xf32>
    %c2 = arith.constant 2 : index
    %c0_19 = arith.constant 0 : index
    %27 = vector.load %arg6[%c2, %c0_19] : memref<12x192xf32, #tpu.memory_space<vmem>>, vector<1x64xf32>
    %28 = vector.broadcast %27 : vector<1x64xf32> to vector<32x64xf32>
    %29 = arith.addf %26, %28 : vector<32x64xf32>
    %cst_20 = arith.constant 1.000000e+00 : f32
    %30 = vector.broadcast %cst_20 : f32 to vector<32x32xf32>
    %31 = arith.subf %1, %30 : vector<32x32xf32>
    %cst_21 = arith.constant 1.000000e+30 : f32
    %32 = vector.broadcast %cst_21 : f32 to vector<32x32xf32>
    %33 = arith.mulf %31, %32 : vector<32x32xf32>
    %cst_22 = arith.constant dense<0.000000e+00> : vector<32xf32>
    %34 = vector.multi_reduction <add>, %29, %cst_22 [1] : vector<32x64xf32> to vector<32xf32>
    %35 = vector.shape_cast %34 : vector<32xf32> to vector<32x1xf32>
    %cst_23 = arith.constant 6.400000e+01 : f32
    %36 = vector.broadcast %cst_23 : f32 to vector<32x1xf32>
    %37 = arith.divf %35, %36 : vector<32x1xf32>
    %38 = vector.broadcast %37 : vector<32x1xf32> to vector<32x64xf32>
    %39 = arith.subf %29, %38 : vector<32x64xf32>
    %40 = arith.mulf %39, %39 : vector<32x64xf32>
    %cst_24 = arith.constant dense<0.000000e+00> : vector<32xf32>
    %41 = vector.multi_reduction <add>, %40, %cst_24 [1] : vector<32x64xf32> to vector<32xf32>
    %42 = vector.shape_cast %41 : vector<32xf32> to vector<32x1xf32>
    %cst_25 = arith.constant 6.400000e+01 : f32
    %43 = vector.broadcast %cst_25 : f32 to vector<32x1xf32>
    %44 = arith.divf %42, %43 : vector<32x1xf32>
    %cst_26 = arith.constant 9.99999974E-6 : f32
    %45 = vector.broadcast %cst_26 : f32 to vector<32x1xf32>
    %46 = arith.addf %44, %45 : vector<32x1xf32>
    %47 = math.rsqrt %46 : vector<32x1xf32>
    %48 = vector.broadcast %47 : vector<32x1xf32> to vector<32x64xf32>
    %49 = arith.mulf %39, %48 : vector<32x64xf32>
    %c0_27 = arith.constant 0 : index
    %c0_28 = arith.constant 0 : index
    %c0_29 = arith.constant 0 : index
    %50 = vector.load %arg3[%c0_27, %c0_28, %c0_29] : memref<2x64x192xf32, #tpu.memory_space<vmem>>, vector<1x64x192xf32>
    %51 = vector.shape_cast %50 : vector<1x64x192xf32> to vector<64x192xf32>
    %cst_30 = arith.constant dense<0.000000e+00> : vector<32x192xf32>
    %52 = tpu.matmul %49, %51, %cst_30 {dimension_numbers = #tpu.dot_dimension_numbers<[1], [0], [0], [1], [0, 0, 1, 1], [], []>} : vector<32x64xf32>, vector<64x192xf32>, vector<32x192xf32> -> vector<32x192xf32>
    %c4 = arith.constant 4 : index
    %c0_31 = arith.constant 0 : index
    %53 = vector.load %arg6[%c4, %c0_31] : memref<12x192xf32, #tpu.memory_space<vmem>>, vector<1x192xf32>
    %54 = vector.broadcast %53 : vector<1x192xf32> to vector<32x192xf32>
    %55 = arith.addf %52, %54 : vector<32x192xf32>
    %56 = vector.extract_strided_slice %55 {offsets = [0, 0], sizes = [32, 32], strides = [1, 1]} : vector<32x192xf32> to vector<32x32xf32>
    %57 = vector.extract_strided_slice %55 {offsets = [0, 64], sizes = [32, 32], strides = [1, 1]} : vector<32x192xf32> to vector<32x32xf32>
    %58 = vector.extract_strided_slice %55 {offsets = [0, 128], sizes = [32, 32], strides = [1, 1]} : vector<32x192xf32> to vector<32x32xf32>
    %59 = tpu.transpose %57, [1, 0] : vector<32x32xf32> -> vector<32x32xf32>
    %cst_32 = arith.constant dense<0.000000e+00> : vector<32x32xf32>
    %60 = tpu.matmul %56, %59, %cst_32 {dimension_numbers = #tpu.dot_dimension_numbers<[1], [0], [0], [1], [0, 0, 1, 1], [], []>} : vector<32x32xf32>, vector<32x32xf32>, vector<32x32xf32> -> vector<32x32xf32>
    %cst_33 = arith.constant 0.176776692 : f32
    %61 = vector.broadcast %cst_33 : f32 to vector<32x32xf32>
    %62 = arith.mulf %60, %61 : vector<32x32xf32>
    %63 = arith.addf %62, %33 : vector<32x32xf32>
    %cst_34 = arith.constant dense<0xFF800000> : vector<32xf32>
    %64 = vector.multi_reduction <maximumf>, %63, %cst_34 [1] : vector<32x32xf32> to vector<32xf32>
    %65 = vector.shape_cast %64 : vector<32xf32> to vector<32x1xf32>
    %66 = vector.broadcast %65 : vector<32x1xf32> to vector<32x32xf32>
    %67 = arith.subf %63, %66 : vector<32x32xf32>
    %68 = math.exp %67 : vector<32x32xf32>
    %cst_35 = arith.constant dense<0.000000e+00> : vector<32xf32>
    %69 = vector.multi_reduction <add>, %68, %cst_35 [1] : vector<32x32xf32> to vector<32xf32>
    %70 = vector.shape_cast %69 : vector<32xf32> to vector<32x1xf32>
    %71 = vector.broadcast %70 : vector<32x1xf32> to vector<32x32xf32>
    %72 = arith.divf %68, %71 : vector<32x32xf32>
    %cst_36 = arith.constant dense<0.000000e+00> : vector<32x32xf32>
    %73 = tpu.matmul %72, %58, %cst_36 {dimension_numbers = #tpu.dot_dimension_numbers<[1], [0], [0], [1], [0, 0, 1, 1], [], []>} : vector<32x32xf32>, vector<32x32xf32>, vector<32x32xf32> -> vector<32x32xf32>
    %74 = vector.extract_strided_slice %55 {offsets = [0, 32], sizes = [32, 32], strides = [1, 1]} : vector<32x192xf32> to vector<32x32xf32>
    %75 = vector.extract_strided_slice %55 {offsets = [0, 96], sizes = [32, 32], strides = [1, 1]} : vector<32x192xf32> to vector<32x32xf32>
    %76 = vector.extract_strided_slice %55 {offsets = [0, 160], sizes = [32, 32], strides = [1, 1]} : vector<32x192xf32> to vector<32x32xf32>
    %77 = tpu.transpose %75, [1, 0] : vector<32x32xf32> -> vector<32x32xf32>
    %cst_37 = arith.constant dense<0.000000e+00> : vector<32x32xf32>
    %78 = tpu.matmul %74, %77, %cst_37 {dimension_numbers = #tpu.dot_dimension_numbers<[1], [0], [0], [1], [0, 0, 1, 1], [], []>} : vector<32x32xf32>, vector<32x32xf32>, vector<32x32xf32> -> vector<32x32xf32>
    %cst_38 = arith.constant 0.176776692 : f32
    %79 = vector.broadcast %cst_38 : f32 to vector<32x32xf32>
    %80 = arith.mulf %78, %79 : vector<32x32xf32>
    %81 = arith.addf %80, %33 : vector<32x32xf32>
    %cst_39 = arith.constant dense<0xFF800000> : vector<32xf32>
    %82 = vector.multi_reduction <maximumf>, %81, %cst_39 [1] : vector<32x32xf32> to vector<32xf32>
    %83 = vector.shape_cast %82 : vector<32xf32> to vector<32x1xf32>
    %84 = vector.broadcast %83 : vector<32x1xf32> to vector<32x32xf32>
    %85 = arith.subf %81, %84 : vector<32x32xf32>
    %86 = math.exp %85 : vector<32x32xf32>
    %cst_40 = arith.constant dense<0.000000e+00> : vector<32xf32>
    %87 = vector.multi_reduction <add>, %86, %cst_40 [1] : vector<32x32xf32> to vector<32xf32>
    %88 = vector.shape_cast %87 : vector<32xf32> to vector<32x1xf32>
    %89 = vector.broadcast %88 : vector<32x1xf32> to vector<32x32xf32>
    %90 = arith.divf %86, %89 : vector<32x32xf32>
    %cst_41 = arith.constant dense<0.000000e+00> : vector<32x32xf32>
    %91 = tpu.matmul %90, %76, %cst_41 {dimension_numbers = #tpu.dot_dimension_numbers<[1], [0], [0], [1], [0, 0, 1, 1], [], []>} : vector<32x32xf32>, vector<32x32xf32>, vector<32x32xf32> -> vector<32x32xf32>
    %92 = tpu.concatenate %73, %91 in 1 : vector<32x32xf32>, vector<32x32xf32> -> vector<32x64xf32>
    %c3 = arith.constant 3 : index
    %c0_42 = arith.constant 0 : index
    %c0_43 = arith.constant 0 : index
    %93 = vector.load %arg2[%c3, %c0_42, %c0_43] : memref<5x64x64xf32, #tpu.memory_space<vmem>>, vector<1x64x64xf32>
    %94 = vector.shape_cast %93 : vector<1x64x64xf32> to vector<64x64xf32>
    %cst_44 = arith.constant dense<0.000000e+00> : vector<32x64xf32>
    %95 = tpu.matmul %92, %94, %cst_44 {dimension_numbers = #tpu.dot_dimension_numbers<[1], [0], [0], [1], [0, 0, 1, 1], [], []>} : vector<32x64xf32>, vector<64x64xf32>, vector<32x64xf32> -> vector<32x64xf32>
    %c5 = arith.constant 5 : index
    %c0_45 = arith.constant 0 : index
    %96 = vector.load %arg6[%c5, %c0_45] : memref<12x192xf32, #tpu.memory_space<vmem>>, vector<1x64xf32>
    %97 = vector.broadcast %96 : vector<1x64xf32> to vector<32x64xf32>
    %98 = arith.addf %95, %97 : vector<32x64xf32>
    %99 = arith.addf %29, %98 : vector<32x64xf32>
    %c0_46 = arith.constant 0 : index
    %c0_47 = arith.constant 0 : index
    %c0_48 = arith.constant 0 : index
    %100 = vector.load %arg4[%c0_46, %c0_47, %c0_48] : memref<2x64x128xf32, #tpu.memory_space<vmem>>, vector<1x64x128xf32>
    %101 = vector.shape_cast %100 : vector<1x64x128xf32> to vector<64x128xf32>
    %cst_49 = arith.constant dense<0.000000e+00> : vector<32x128xf32>
    %102 = tpu.matmul %99, %101, %cst_49 {dimension_numbers = #tpu.dot_dimension_numbers<[1], [0], [0], [1], [0, 0, 1, 1], [], []>} : vector<32x64xf32>, vector<64x128xf32>, vector<32x128xf32> -> vector<32x128xf32>
    %c6 = arith.constant 6 : index
    %c0_50 = arith.constant 0 : index
    %103 = vector.load %arg6[%c6, %c0_50] : memref<12x192xf32, #tpu.memory_space<vmem>>, vector<1x128xf32>
    %104 = vector.broadcast %103 : vector<1x128xf32> to vector<32x128xf32>
    %105 = arith.addf %102, %104 : vector<32x128xf32>
    %cst_51 = arith.constant 5.000000e-01 : f32
    %106 = vector.broadcast %cst_51 : f32 to vector<32x128xf32>
    %107 = arith.mulf %106, %105 : vector<32x128xf32>
    %cst_52 = arith.constant 4.471500e-02 : f32
    %108 = vector.broadcast %cst_52 : f32 to vector<32x128xf32>
    %109 = arith.mulf %108, %105 : vector<32x128xf32>
    %110 = arith.mulf %109, %105 : vector<32x128xf32>
    %111 = arith.mulf %110, %105 : vector<32x128xf32>
    %112 = arith.addf %105, %111 : vector<32x128xf32>
    %cst_53 = arith.constant 0.797884583 : f32
    %113 = vector.broadcast %cst_53 : f32 to vector<32x128xf32>
    %114 = arith.mulf %113, %112 : vector<32x128xf32>
    %115 = math.tanh %114 : vector<32x128xf32>
    %cst_54 = arith.constant 1.000000e+00 : f32
    %116 = vector.broadcast %cst_54 : f32 to vector<32x128xf32>
    %117 = arith.addf %116, %115 : vector<32x128xf32>
    %118 = arith.mulf %107, %117 : vector<32x128xf32>
    %c0_55 = arith.constant 0 : index
    %c0_56 = arith.constant 0 : index
    %c0_57 = arith.constant 0 : index
    %119 = vector.load %arg5[%c0_55, %c0_56, %c0_57] : memref<2x128x64xf32, #tpu.memory_space<vmem>>, vector<1x128x64xf32>
    %120 = vector.shape_cast %119 : vector<1x128x64xf32> to vector<128x64xf32>
    %cst_58 = arith.constant dense<0.000000e+00> : vector<32x64xf32>
    %121 = tpu.matmul %118, %120, %cst_58 {dimension_numbers = #tpu.dot_dimension_numbers<[1], [0], [0], [1], [0, 0, 1, 1], [], []>} : vector<32x128xf32>, vector<128x64xf32>, vector<32x64xf32> -> vector<32x64xf32>
    %122 = arith.addf %99, %121 : vector<32x64xf32>
    %c7 = arith.constant 7 : index
    %c0_59 = arith.constant 0 : index
    %123 = vector.load %arg6[%c7, %c0_59] : memref<12x192xf32, #tpu.memory_space<vmem>>, vector<1x64xf32>
    %124 = vector.broadcast %123 : vector<1x64xf32> to vector<32x64xf32>
    %125 = arith.addf %122, %124 : vector<32x64xf32>
    %cst_60 = arith.constant dense<0.000000e+00> : vector<32xf32>
    %126 = vector.multi_reduction <add>, %125, %cst_60 [1] : vector<32x64xf32> to vector<32xf32>
    %127 = vector.shape_cast %126 : vector<32xf32> to vector<32x1xf32>
    %cst_61 = arith.constant 6.400000e+01 : f32
    %128 = vector.broadcast %cst_61 : f32 to vector<32x1xf32>
    %129 = arith.divf %127, %128 : vector<32x1xf32>
    %130 = vector.broadcast %129 : vector<32x1xf32> to vector<32x64xf32>
    %131 = arith.subf %125, %130 : vector<32x64xf32>
    %132 = arith.mulf %131, %131 : vector<32x64xf32>
    %cst_62 = arith.constant dense<0.000000e+00> : vector<32xf32>
    %133 = vector.multi_reduction <add>, %132, %cst_62 [1] : vector<32x64xf32> to vector<32xf32>
    %134 = vector.shape_cast %133 : vector<32xf32> to vector<32x1xf32>
    %cst_63 = arith.constant 6.400000e+01 : f32
    %135 = vector.broadcast %cst_63 : f32 to vector<32x1xf32>
    %136 = arith.divf %134, %135 : vector<32x1xf32>
    %cst_64 = arith.constant 9.99999974E-6 : f32
    %137 = vector.broadcast %cst_64 : f32 to vector<32x1xf32>
    %138 = arith.addf %136, %137 : vector<32x1xf32>
    %139 = math.rsqrt %138 : vector<32x1xf32>
    %140 = vector.broadcast %139 : vector<32x1xf32> to vector<32x64xf32>
    %141 = arith.mulf %131, %140 : vector<32x64xf32>
    %c1_65 = arith.constant 1 : index
    %c0_66 = arith.constant 0 : index
    %c0_67 = arith.constant 0 : index
    %142 = vector.load %arg3[%c1_65, %c0_66, %c0_67] : memref<2x64x192xf32, #tpu.memory_space<vmem>>, vector<1x64x192xf32>
    %143 = vector.shape_cast %142 : vector<1x64x192xf32> to vector<64x192xf32>
    %cst_68 = arith.constant dense<0.000000e+00> : vector<32x192xf32>
    %144 = tpu.matmul %141, %143, %cst_68 {dimension_numbers = #tpu.dot_dimension_numbers<[1], [0], [0], [1], [0, 0, 1, 1], [], []>} : vector<32x64xf32>, vector<64x192xf32>, vector<32x192xf32> -> vector<32x192xf32>
    %c8 = arith.constant 8 : index
    %c0_69 = arith.constant 0 : index
    %145 = vector.load %arg6[%c8, %c0_69] : memref<12x192xf32, #tpu.memory_space<vmem>>, vector<1x192xf32>
    %146 = vector.broadcast %145 : vector<1x192xf32> to vector<32x192xf32>
    %147 = arith.addf %144, %146 : vector<32x192xf32>
    %148 = vector.extract_strided_slice %147 {offsets = [0, 0], sizes = [32, 32], strides = [1, 1]} : vector<32x192xf32> to vector<32x32xf32>
    %149 = vector.extract_strided_slice %147 {offsets = [0, 64], sizes = [32, 32], strides = [1, 1]} : vector<32x192xf32> to vector<32x32xf32>
    %150 = vector.extract_strided_slice %147 {offsets = [0, 128], sizes = [32, 32], strides = [1, 1]} : vector<32x192xf32> to vector<32x32xf32>
    %151 = tpu.transpose %149, [1, 0] : vector<32x32xf32> -> vector<32x32xf32>
    %cst_70 = arith.constant dense<0.000000e+00> : vector<32x32xf32>
    %152 = tpu.matmul %148, %151, %cst_70 {dimension_numbers = #tpu.dot_dimension_numbers<[1], [0], [0], [1], [0, 0, 1, 1], [], []>} : vector<32x32xf32>, vector<32x32xf32>, vector<32x32xf32> -> vector<32x32xf32>
    %cst_71 = arith.constant 0.176776692 : f32
    %153 = vector.broadcast %cst_71 : f32 to vector<32x32xf32>
    %154 = arith.mulf %152, %153 : vector<32x32xf32>
    %155 = arith.addf %154, %33 : vector<32x32xf32>
    %cst_72 = arith.constant dense<0xFF800000> : vector<32xf32>
    %156 = vector.multi_reduction <maximumf>, %155, %cst_72 [1] : vector<32x32xf32> to vector<32xf32>
    %157 = vector.shape_cast %156 : vector<32xf32> to vector<32x1xf32>
    %158 = vector.broadcast %157 : vector<32x1xf32> to vector<32x32xf32>
    %159 = arith.subf %155, %158 : vector<32x32xf32>
    %160 = math.exp %159 : vector<32x32xf32>
    %cst_73 = arith.constant dense<0.000000e+00> : vector<32xf32>
    %161 = vector.multi_reduction <add>, %160, %cst_73 [1] : vector<32x32xf32> to vector<32xf32>
    %162 = vector.shape_cast %161 : vector<32xf32> to vector<32x1xf32>
    %163 = vector.broadcast %162 : vector<32x1xf32> to vector<32x32xf32>
    %164 = arith.divf %160, %163 : vector<32x32xf32>
    %cst_74 = arith.constant dense<0.000000e+00> : vector<32x32xf32>
    %165 = tpu.matmul %164, %150, %cst_74 {dimension_numbers = #tpu.dot_dimension_numbers<[1], [0], [0], [1], [0, 0, 1, 1], [], []>} : vector<32x32xf32>, vector<32x32xf32>, vector<32x32xf32> -> vector<32x32xf32>
    %166 = vector.extract_strided_slice %147 {offsets = [0, 32], sizes = [32, 32], strides = [1, 1]} : vector<32x192xf32> to vector<32x32xf32>
    %167 = vector.extract_strided_slice %147 {offsets = [0, 96], sizes = [32, 32], strides = [1, 1]} : vector<32x192xf32> to vector<32x32xf32>
    %168 = vector.extract_strided_slice %147 {offsets = [0, 160], sizes = [32, 32], strides = [1, 1]} : vector<32x192xf32> to vector<32x32xf32>
    %169 = tpu.transpose %167, [1, 0] : vector<32x32xf32> -> vector<32x32xf32>
    %cst_75 = arith.constant dense<0.000000e+00> : vector<32x32xf32>
    %170 = tpu.matmul %166, %169, %cst_75 {dimension_numbers = #tpu.dot_dimension_numbers<[1], [0], [0], [1], [0, 0, 1, 1], [], []>} : vector<32x32xf32>, vector<32x32xf32>, vector<32x32xf32> -> vector<32x32xf32>
    %cst_76 = arith.constant 0.176776692 : f32
    %171 = vector.broadcast %cst_76 : f32 to vector<32x32xf32>
    %172 = arith.mulf %170, %171 : vector<32x32xf32>
    %173 = arith.addf %172, %33 : vector<32x32xf32>
    %cst_77 = arith.constant dense<0xFF800000> : vector<32xf32>
    %174 = vector.multi_reduction <maximumf>, %173, %cst_77 [1] : vector<32x32xf32> to vector<32xf32>
    %175 = vector.shape_cast %174 : vector<32xf32> to vector<32x1xf32>
    %176 = vector.broadcast %175 : vector<32x1xf32> to vector<32x32xf32>
    %177 = arith.subf %173, %176 : vector<32x32xf32>
    %178 = math.exp %177 : vector<32x32xf32>
    %cst_78 = arith.constant dense<0.000000e+00> : vector<32xf32>
    %179 = vector.multi_reduction <add>, %178, %cst_78 [1] : vector<32x32xf32> to vector<32xf32>
    %180 = vector.shape_cast %179 : vector<32xf32> to vector<32x1xf32>
    %181 = vector.broadcast %180 : vector<32x1xf32> to vector<32x32xf32>
    %182 = arith.divf %178, %181 : vector<32x32xf32>
    %cst_79 = arith.constant dense<0.000000e+00> : vector<32x32xf32>
    %183 = tpu.matmul %182, %168, %cst_79 {dimension_numbers = #tpu.dot_dimension_numbers<[1], [0], [0], [1], [0, 0, 1, 1], [], []>} : vector<32x32xf32>, vector<32x32xf32>, vector<32x32xf32> -> vector<32x32xf32>
    %184 = tpu.concatenate %165, %183 in 1 : vector<32x32xf32>, vector<32x32xf32> -> vector<32x64xf32>
    %c4_80 = arith.constant 4 : index
    %c0_81 = arith.constant 0 : index
    %c0_82 = arith.constant 0 : index
    %185 = vector.load %arg2[%c4_80, %c0_81, %c0_82] : memref<5x64x64xf32, #tpu.memory_space<vmem>>, vector<1x64x64xf32>
    %186 = vector.shape_cast %185 : vector<1x64x64xf32> to vector<64x64xf32>
    %cst_83 = arith.constant dense<0.000000e+00> : vector<32x64xf32>
    %187 = tpu.matmul %184, %186, %cst_83 {dimension_numbers = #tpu.dot_dimension_numbers<[1], [0], [0], [1], [0, 0, 1, 1], [], []>} : vector<32x64xf32>, vector<64x64xf32>, vector<32x64xf32> -> vector<32x64xf32>
    %c9 = arith.constant 9 : index
    %c0_84 = arith.constant 0 : index
    %188 = vector.load %arg6[%c9, %c0_84] : memref<12x192xf32, #tpu.memory_space<vmem>>, vector<1x64xf32>
    %189 = vector.broadcast %188 : vector<1x64xf32> to vector<32x64xf32>
    %190 = arith.addf %187, %189 : vector<32x64xf32>
    %191 = arith.addf %125, %190 : vector<32x64xf32>
    %c1_85 = arith.constant 1 : index
    %c0_86 = arith.constant 0 : index
    %c0_87 = arith.constant 0 : index
    %192 = vector.load %arg4[%c1_85, %c0_86, %c0_87] : memref<2x64x128xf32, #tpu.memory_space<vmem>>, vector<1x64x128xf32>
    %193 = vector.shape_cast %192 : vector<1x64x128xf32> to vector<64x128xf32>
    %cst_88 = arith.constant dense<0.000000e+00> : vector<32x128xf32>
    %194 = tpu.matmul %191, %193, %cst_88 {dimension_numbers = #tpu.dot_dimension_numbers<[1], [0], [0], [1], [0, 0, 1, 1], [], []>} : vector<32x64xf32>, vector<64x128xf32>, vector<32x128xf32> -> vector<32x128xf32>
    %c10 = arith.constant 10 : index
    %c0_89 = arith.constant 0 : index
    %195 = vector.load %arg6[%c10, %c0_89] : memref<12x192xf32, #tpu.memory_space<vmem>>, vector<1x128xf32>
    %196 = vector.broadcast %195 : vector<1x128xf32> to vector<32x128xf32>
    %197 = arith.addf %194, %196 : vector<32x128xf32>
    %cst_90 = arith.constant 5.000000e-01 : f32
    %198 = vector.broadcast %cst_90 : f32 to vector<32x128xf32>
    %199 = arith.mulf %198, %197 : vector<32x128xf32>
    %cst_91 = arith.constant 4.471500e-02 : f32
    %200 = vector.broadcast %cst_91 : f32 to vector<32x128xf32>
    %201 = arith.mulf %200, %197 : vector<32x128xf32>
    %202 = arith.mulf %201, %197 : vector<32x128xf32>
    %203 = arith.mulf %202, %197 : vector<32x128xf32>
    %204 = arith.addf %197, %203 : vector<32x128xf32>
    %cst_92 = arith.constant 0.797884583 : f32
    %205 = vector.broadcast %cst_92 : f32 to vector<32x128xf32>
    %206 = arith.mulf %205, %204 : vector<32x128xf32>
    %207 = math.tanh %206 : vector<32x128xf32>
    %cst_93 = arith.constant 1.000000e+00 : f32
    %208 = vector.broadcast %cst_93 : f32 to vector<32x128xf32>
    %209 = arith.addf %208, %207 : vector<32x128xf32>
    %210 = arith.mulf %199, %209 : vector<32x128xf32>
    %c1_94 = arith.constant 1 : index
    %c0_95 = arith.constant 0 : index
    %c0_96 = arith.constant 0 : index
    %211 = vector.load %arg5[%c1_94, %c0_95, %c0_96] : memref<2x128x64xf32, #tpu.memory_space<vmem>>, vector<1x128x64xf32>
    %212 = vector.shape_cast %211 : vector<1x128x64xf32> to vector<128x64xf32>
    %cst_97 = arith.constant dense<0.000000e+00> : vector<32x64xf32>
    %213 = tpu.matmul %210, %212, %cst_97 {dimension_numbers = #tpu.dot_dimension_numbers<[1], [0], [0], [1], [0, 0, 1, 1], [], []>} : vector<32x128xf32>, vector<128x64xf32>, vector<32x64xf32> -> vector<32x64xf32>
    %214 = arith.addf %191, %213 : vector<32x64xf32>
    %c11 = arith.constant 11 : index
    %c0_98 = arith.constant 0 : index
    %215 = vector.load %arg6[%c11, %c0_98] : memref<12x192xf32, #tpu.memory_space<vmem>>, vector<1x64xf32>
    %216 = vector.broadcast %215 : vector<1x64xf32> to vector<32x64xf32>
    %217 = arith.addf %214, %216 : vector<32x64xf32>
    %c2_99 = arith.constant 2 : index
    %c0_100 = arith.constant 0 : index
    %c0_101 = arith.constant 0 : index
    %218 = vector.load %arg2[%c2_99, %c0_100, %c0_101] : memref<5x64x64xf32, #tpu.memory_space<vmem>>, vector<1x64x64xf32>
    %219 = vector.shape_cast %218 : vector<1x64x64xf32> to vector<64x64xf32>
    %cst_102 = arith.constant dense<0.000000e+00> : vector<32x64xf32>
    %220 = tpu.matmul %217, %219, %cst_102 {dimension_numbers = #tpu.dot_dimension_numbers<[1], [0], [0], [1], [0, 0, 1, 1], [], []>} : vector<32x64xf32>, vector<64x64xf32>, vector<32x64xf32> -> vector<32x64xf32>
    %c3_103 = arith.constant 3 : index
    %c0_104 = arith.constant 0 : index
    %221 = vector.load %arg6[%c3_103, %c0_104] : memref<12x192xf32, #tpu.memory_space<vmem>>, vector<1x64xf32>
    %222 = vector.broadcast %221 : vector<1x64xf32> to vector<32x64xf32>
    %223 = arith.addf %220, %222 : vector<32x64xf32>
    %c0_105 = arith.constant 0 : index
    %c0_106 = arith.constant 0 : index
    %224 = vector.load %arg7[%c0_105, %c0_106] : memref<32x64xf32, #tpu.memory_space<vmem>>, vector<32x64xf32>
    tpu.vector_store %arg7[%c0_105, %c0_106], %223 {strides = array<i32>} : memref<32x64xf32, #tpu.memory_space<vmem>>, vector<32x64xf32>,
    return
  }
}

</mosaic_0001>

<bundles_post_ra>
// kernel: transformer1d_forward.1
= control target key start
LH: loop header
LB: loop body
LE: loop exit
PB: predicated region body
PF: predicated region fallthrough
CT: control target
= control target key end

     0   :  { %12 = vsyncpa [#allocation3], 0  ;;  %s4710_s0 = inlined_call_operand.vmem [shape: f32[32,64], index: 0, kind: input, shape index: {}]   ;;  %s4711_s1 = inlined_call_operand.vmem [shape: f32[32,32], index: 1, kind: input, shape index: {}]   ;;  %s4712_s2 = inlined_call_operand.vmem [shape: f32[5,64,64], index: 2, kind: input, shape index: {}]   ;;  %s4713_s3 = inlined_call_operand.hbm [shape: f32[2,64,192], index: 3, kind: input, shape index: {}]   ;;  %s4714_s4 = inlined_call_operand.hbm [shape: f32[2,64,128], index: 4, kind: input, shape index: {}]   ;;  %s4715_s5 = inlined_call_operand.vmem [shape: f32[2,128,64], index: 5, kind: input, shape index: {}]   ;;  %s4716_s6 = inlined_call_operand.vmem [shape: f32[12,192], index: 6, kind: input, shape index: {}]   ;;  %s4717_s7 = inlined_call_operand.hbm [shape: f32[32,64], index: 7, kind: output, shape index: {}]  }
   0x1   :  { %13 = vsyncpa [#allocation6], 0 }
   0x2   :  { %14 = vsyncpa [#allocation4], 0  ;;  %s3892_s24 = smov [#allocation2]  }
   0x3   :  { %s26_s25 = sshll.u32 %s3892_s24, 4  ;;  %s27_s25 = int_to_ptr.vmem [resolvable:$true] %s26_s25 }
   0x4   :  { %s3834_s26 = scalar_lea.vmem %s27_s25, 4096  ;;  %p3839_p1 = scmp.lt.s32.totalorder %s27_s25, %s27_s25 }
   0x5   :  { %p3835_p0 = scmp.ne.s32.totalorder %s27_s25, %s3834_s26  ;;  %p3840_p2 = scmp.lt.s32.totalorder %s3834_s26, %s3834_s26 }
   0x7   :  { %p3841_p3 = por %p3840_p2, %p3839_p1 }
   0x9   :  { %p3842_p4 = pnand %p3841_p3, %p3835_p0 }
   0xb   :  { %3845 = shalt.err (!%p3842_p4)
}
   0xc   :  { %s3893_s27 = smov 256   ;;  %s3894_s28 = smov 16  }
   0xd   :  { %32 = dma.hbm_to_vmem [thread:$0]  %s4713_s3, 4096, %s27_s25, [#allocation3], %s3893_s27, %s3893_s27, %s3894_s28  }
   0xe   :  { %s3895_s8 = smov [#allocation5]  }
   0xf   :  { %s38_s9 = sshll.u32 %s3895_s8, 4  ;;  %s39_s9 = int_to_ptr.vmem [resolvable:$true] %s38_s9 }
  0x10   :  { %s3854_s10 = scalar_lea.vmem %s39_s9, 2048  ;;  %p3859_p6 = scmp.lt.s32.totalorder %s39_s9, %s39_s9 }
  0x11   :  { %p3855_p5 = scmp.ne.s32.totalorder %s39_s9, %s3854_s10  ;;  %p3860_p7 = scmp.lt.s32.totalorder %s3854_s10, %s3854_s10 }
  0x13   :  { %p3861_p8 = por %p3860_p7, %p3859_p6 }
  0x15   :  { %p3862_p9 = pnand %p3861_p8, %p3855_p5 }
  0x17   :  { %3865 = shalt.err (!%p3862_p9)
}
  0x18   :  { %s3896_s11 = smov 128   ;;  %s3897_s12 = smov 8  }
  0x19   :  { %44 = dma.hbm_to_vmem [thread:$0]  %s4714_s4, 2048, %s39_s9, [#allocation6], %s3896_s11, %s3896_s11, %s3897_s12  }
  0x1a   :  { %3886 = dma.done.wait [#allocation3], 4096  }
  0x1b   :  { %3887 = vsyncadd [#allocation3], 4294963200 }
  0x1c   :  { %3888 = dma.done.wait [#allocation6], 2048  }
  0x1d   :  { %3889 = vsyncadd [#allocation6], 4294965248  ;;  %vm71_vm0 = vcmask 261120   ;;  %v58_v0 = vld [vmem:[%s4710_s0 + $0x18] sm:$0xff]  ;;  %v3958_v1 = vld [vmem:[%s4710_s0 + $0x10] sm:$0xff]  ;;  %vm169_vm1 = vcmask 523264  }
  0x1e   :  { %3319 = vmatprep.subr.mxu1 %v58_v0  ;;  %v3963_v2 = vld [vmem:[%s4711_s1] sm:$0xff]  ;;  %v56_v3 = vld [vmem:[%s4710_s0 + $0x8] sm:$0xff]  ;;  %v3985_v6 = vld [vmem:[%s4712_s2 + $0x38] sm:$0xff]  ;;  %s3899_s4 = smov 64   ;;  %s3900_s20 = smov 32  }
  0x1f   :  { %3320 = vmatpush3.msra.mxu1 %v58_v0  ;;  %3327 = vmatprep.mubr.msk.f32.mxu1 %vm71_vm0, %v3963_v2  ;;  %v55_v4 = vld [vmem:[%s4710_s0] sm:$0xff]  ;;  %v3980_v5 = vld [vmem:[%s4711_s1 + $0x8] sm:$0xff]  ;;  %v3990_v7 = vld [vmem:[%s4711_s1 + $0x10] sm:$0xff]  ;;  %s3901_s21 = smov 96   ;;  %s3902_s0 = smov [#allocation7]  }
  0x20   :  { %3321 = vmatprep.subr.mxu1 %v3958_v1  ;;  %3363 = vmatprep.mubr.msk.f32.mxu0 %vm71_vm0, %v3963_v2  ;;  %v3995_v8 = vld [vmem:[%s4712_s2 + $0x30] sm:$0xff]  ;;  %v4005_v9 = vld [vmem:[%s4711_s1 + $0x18] sm:$0xff]  ;;  %v68_v10 = vld [vmem:[%s4712_s2 + $0x28] sm:$0xff]  ;;  %s2940_s29 = sshll.u32 %s3902_s0, 4  ;;  %s2941_s29 = int_to_ptr.vmem [resolvable:$true] %s2940_s29 }
  0x21   :  { %3322 = vmatpush3.msra.mxu1 %v3958_v1  ;;  %v67_v11 = vld [vmem:[%s4712_s2 + $0x20] sm:$0xff]  ;;  %v66_v12 = vld [vmem:[%s4712_s2 + $0x18] sm:$0xff]  ;;  %v65_v13 = vld [vmem:[%s4712_s2 + $0x10] sm:$0xff]  ;;  %p3871_p11 = scmp.lt.s32.totalorder %s2941_s29, %s2941_s29 }
  0x22   :  { %3323 = vmatprep.subr.mxu1 %v56_v3  ;;  %v64_v14 = vld [vmem:[%s4712_s2 + $0x8] sm:$0xff]  ;;  %v63_v15 = vld [vmem:[%s4712_s2] sm:$0xff]  ;;  %v2976_v40 = vld [vmem:[%s4712_s2 + $0x78] sm:$0xff] }
  0x23   :  { %3324 = vmatpush3.msra.mxu1 %v56_v3  ;;  %v2975_v41 = vld [vmem:[%s4712_s2 + $0x70] sm:$0xff]  ;;  %v2974_v42 = vld [vmem:[%s4712_s2 + $0x68] sm:$0xff]  ;;  %v2973_v43 = vld [vmem:[%s4712_s2 + $0x60] sm:$0xff] }
  0x24   :  { %3325 = vmatprep.subr.mxu1 %v55_v4  ;;  %v2972_v44 = vld [vmem:[%s4712_s2 + $0x58] sm:$0xff]  ;;  %v2971_v45 = vld [vmem:[%s4712_s2 + $0x50] sm:$0xff]  ;;  %v2970_v46 = vld [vmem:[%s4712_s2 + $0x48] sm:$0xff] }
  0x25   :  { %3326 = vmatpush3.msra.mxu1 %v55_v4  ;;  %v2969_v47 = vld [vmem:[%s4712_s2 + $0x40] sm:$0xff] }
  0x26   :  { %3328 = vmatmul.mubr.msk.f32.vlgmr.msra.gmra.mxu1 %vm71_vm0, %v3980_v5  ;;  %3333 = vmatprep.subr.mxu1 %v3985_v6  ;;  %v477_v62 = vld [vmem:[%s4716_s6] ss:$0 sm:$0xff] }
  0x27   :  { %3330 = vmatprep.mubr.msk.f32.mxu1 %vm71_vm0, %v3990_v7  ;;  %3334 = vmatpush3.msra.mxu1 %v3985_v6 }
  0x28   :  { %3335 = vmatprep.subr.mxu1 %v3995_v8 }
  0x29   :  { %3336 = vmatpush3.msra.mxu1 %v3995_v8 }
  0x2a   :  { %3331 = vmatmul.mubr.msk.f32.gmra.mxu1 %vm71_vm0, %v4005_v9  ;;  %3337 = vmatprep.subr.mxu1 %v68_v10 }
  0x2b   :  { %3338 = vmatpush3.msra.mxu1 %v68_v10 }
  0x2c   :  { %3339 = vmatprep.subr.mxu1 %v67_v11 }
  0x2d   :  { %3340 = vmatpush3.msra.mxu1 %v67_v11 }
  0x2e   :  { %3341 = vmatprep.subr.mxu1 %v66_v12 }
  0x2f   :  { %3342 = vmatpush3.msra.mxu1 %v66_v12 }
  0x30   :  { %3343 = vmatprep.subr.mxu1 %v65_v13 }
  0x31   :  { %3344 = vmatpush3.msra.mxu1 %v65_v13 }
  0x32   :  { %3345 = vmatprep.subr.mxu1 %v64_v14 }
  0x33   :  { %3346 = vmatpush3.msra.mxu1 %v64_v14 }
  0x34   :  { %3347 = vmatprep.subr.mxu1 %v63_v15 }
  0x35   :  { %3348 = vmatpush3.msra.mxu1 %v63_v15 }
  0x36   :  { %3391 = vmatprep.subr.mxu1 %v2976_v40 }
  0xe6   :  { %v3329_v16 = vpop.f32.mrf.mxu1 }
  0xe8   :  { %v150_v17 = vpop.f32.mrf.mxu1 }
  0xe9   :  { %3349 = vmatprep.mubr.msk.f32.mxu1 %vm169_vm1, %v150_v17 }
  0xea   :  { %v3332_v18 = vpop.f32.mrf.mxu1  ;;  %3350 = vmatmul.mubr.msk.f32.vlgmr.msra.gmra.mxu1 %vm169_vm1, %v3329_v16 }
  0xeb   :  { %3392 = vmatpush3.msra.mxu1 %v2976_v40 }
  0xec   :  { %v160_v19 = vpop.f32.mrf.mxu1  ;;  %3393 = vmatprep.subr.mxu1 %v2975_v41 }
  0xed   :  { %3352 = vmatprep.mubr.msk.f32.mxu1 %vm169_vm1, %v160_v19  ;;  %3394 = vmatpush3.msra.mxu1 %v2975_v41  ;;  %v496_v19 = vld [vmem:[%s4716_s6 + $0x2] ss:$0 sm:$0xff] }
  0xee   :  { %3353 = vmatmul.mubr.msk.f32.gmra.mxu1 %vm169_vm1, %v3332_v18  ;;  %3395 = vmatprep.subr.mxu1 %v2974_v42 }
  0xef   :  { %3396 = vmatpush3.msra.mxu1 %v2974_v42 }
  0xf0   :  { %3397 = vmatprep.subr.mxu1 %v2973_v43 }
  0xf1   :  { %3398 = vmatpush3.msra.mxu1 %v2973_v43 }
  0xf2   :  { %3399 = vmatprep.subr.mxu1 %v2972_v44 }
  0xf3   :  { %3400 = vmatpush3.msra.mxu1 %v2972_v44 }
  0xf4   :  { %3401 = vmatprep.subr.mxu1 %v2971_v45 }
  0xf5   :  { %3402 = vmatpush3.msra.mxu1 %v2971_v45 }
  0xf6   :  { %3403 = vmatprep.subr.mxu1 %v2970_v46 }
  0xf7   :  { %3404 = vmatpush3.msra.mxu1 %v2970_v46 }
  0xf8   :  { %3405 = vmatprep.subr.mxu1 %v2969_v47 }
  0xf9   :  { %3406 = vmatpush3.msra.mxu1 %v2969_v47 }
 0x1aa   :  { %v3351_v20 = vpop.f32.mrf.mxu1 }
 0x1ab   :  { %v268_v23 = vmul.f32 0.03125, %v3351_v20 }
 0x1ac   :  { %v248_v21 = vpop.f32.mrf.mxu1 }
 0x1ad   :  { %v267_v26 = vmul.f32 0.03125, %v248_v21  ;;  %v4036_v29 = vsub.f32 %v56_v3, %v268_v23 }
 0x1ae   :  { %v3354_v22 = vpop.f32.mrf.mxu1 }
 0x1af   :  { %v270_v24 = vmul.f32 0.03125, %v3354_v22  ;;  %v4043_v32 = vsub.f32 %v55_v4, %v267_v26  ;;  %v276_v34 = vmul.f32 %v4036_v29, %v4036_v29 }
 0x1b0   :  { %v258_v25 = vpop.f32.mrf.mxu1 }
 0x1b1   :  { %v4034_v27 = vsub.f32 %v58_v0, %v270_v24  ;;  %v269_v28 = vmul.f32 0.03125, %v258_v25  ;;  %v275_v35 = vmul.f32 %v4043_v32, %v4043_v32 }
 0x1b3   :  { %v4039_v30 = vsub.f32 %v3958_v1, %v269_v28  ;;  %v278_v31 = vmul.f32 %v4034_v27, %v4034_v27 }
 0x1b5   :  { %3355 = vmatprep.subr.mxu0 %v278_v31  ;;  %v277_v33 = vmul.f32 %v4039_v30, %v4039_v30 }
 0x1b6   :  { %3356 = vmatpush3.msra.mxu0 %v278_v31 }
 0x1b7   :  { %3357 = vmatprep.subr.mxu0 %v277_v33 }
 0x1b8   :  { %3358 = vmatpush3.msra.mxu0 %v277_v33 }
 0x1b9   :  { %3359 = vmatprep.subr.mxu0 %v276_v34 }
 0x1ba   :  { %3360 = vmatpush3.msra.mxu0 %v276_v34 }
 0x1bb   :  { %3361 = vmatprep.subr.mxu0 %v275_v35 }
 0x1bc   :  { %3362 = vmatpush3.msra.mxu0 %v275_v35 }
 0x1bd   :  { %3364 = vmatmul.mubr.msk.f32.vlgmr.msra.gmra.mxu0 %vm71_vm0, %v3980_v5  ;;  %3369 = vmatprep.subr.mxu0 %v3985_v6 }
 0x1be   :  { %3366 = vmatprep.mubr.msk.f32.mxu0 %vm71_vm0, %v3990_v7  ;;  %3370 = vmatpush3.msra.mxu0 %v3985_v6  ;;  %v482_v6 = vld [vmem:[%s4716_s6 + $0x1] ss:$0 sm:$0xff] }
 0x1bf   :  { %3371 = vmatprep.subr.mxu0 %v3995_v8 }
 0x1c0   :  { %3372 = vmatpush3.msra.mxu0 %v3995_v8 }
 0x1c1   :  { %3367 = vmatmul.mubr.msk.f32.gmra.mxu0 %vm71_vm0, %v4005_v9  ;;  %3373 = vmatprep.subr.mxu0 %v68_v10 }
 0x1c2   :  { %3374 = vmatpush3.msra.mxu0 %v68_v10 }
 0x1c3   :  { %3375 = vmatprep.subr.mxu0 %v67_v11 }
 0x1c4   :  { %3376 = vmatpush3.msra.mxu0 %v67_v11 }
 0x1c5   :  { %3377 = vmatprep.subr.mxu0 %v66_v12 }
 0x1c6   :  { %3378 = vmatpush3.msra.mxu0 %v66_v12 }
 0x1c7   :  { %3379 = vmatprep.subr.mxu0 %v65_v13 }
 0x1c8   :  { %3380 = vmatpush3.msra.mxu0 %v65_v13 }
 0x1c9   :  { %3381 = vmatprep.subr.mxu0 %v64_v14 }
 0x1ca   :  { %3382 = vmatpush3.msra.mxu0 %v64_v14 }
 0x1cb   :  { %3383 = vmatprep.subr.mxu0 %v63_v15 }
 0x1cc   :  { %3384 = vmatpush3.msra.mxu0 %v63_v15 }
 0x27d   :  { %v3365_v36 = vpop.f32.mrf.mxu0 }
 0x27f   :  { %v345_v37 = vpop.f32.mrf.mxu0 }
 0x280   :  { %3385 = vmatprep.mubr.msk.f32.mxu0 %vm169_vm1, %v345_v37 }
 0x281   :  { %v3368_v38 = vpop.f32.mrf.mxu0  ;;  %3386 = vmatmul.mubr.msk.f32.vlgmr.msra.gmra.mxu0 %vm169_vm1, %v3365_v36 }
 0x283   :  { %v355_v39 = vpop.f32.mrf.mxu0 }
 0x284   :  { %3388 = vmatprep.mubr.msk.f32.mxu0 %vm169_vm1, %v355_v39 }
 0x285   :  { %3389 = vmatmul.mubr.msk.f32.gmra.mxu0 %vm169_vm1, %v3368_v38 }
 0x341   :  { %v3387_v48 = vpop.f32.mrf.mxu0 }
 0x342   :  { %v462_v49 = vmul.f32 0.03125, %v3387_v48 }
 0x343   :  { %v442_v50 = vpop.f32.mrf.mxu0 }
 0x344   :  { %v466_v51 = vadd.f32 1e-06, %v462_v49  ;;  %v461_v52 = vmul.f32 0.03125, %v442_v50 }
 0x345   :  { %v3390_v53 = vpop.f32.mrf.mxu0 }
 0x346   :  { %3722 = vrsqrt.f32 %v466_v51  ;;  %v465_v54 = vadd.f32 1e-06, %v461_v52  ;;  %v464_v55 = vmul.f32 0.03125, %v3390_v53  ;;  %v670_v51 = vld [vmem:[#allocation2 + $0x78] sm:$0xff]  ;;  %v669_v52 = vld [vmem:[#allocation2 + $0x70] sm:$0xff]  ;;  %v668_v53 = vld [vmem:[#allocation2 + $0x68] sm:$0xff] }
 0x347   :  { %v452_v56 = vpop.f32.mrf.mxu0  ;;  %712 = vmatprep.subr.mxu0 %v670_v51 }
 0x348   :  { %3724 = vrsqrt.f32 %v465_v54  ;;  %v468_v57 = vadd.f32 1e-06, %v464_v55  ;;  %v463_v58 = vmul.f32 0.03125, %v452_v56  ;;  %713 = vmatpush1.msra.mxu0 %v669_v52  ;;  %v667_v54 = vld [vmem:[#allocation2 + $0x60] sm:$0xff]  ;;  %v666_v55 = vld [vmem:[#allocation2 + $0x58] sm:$0xff]  ;;  %v665_v56 = vld [vmem:[#allocation2 + $0x50] sm:$0xff] }
 0x349   :  { %714 = vmatprep.subr.mxu0 %v668_v53 }
 0x34a   :  { %3726 = vrsqrt.f32 %v468_v57  ;;  %v467_v59 = vadd.f32 1e-06, %v463_v58  ;;  %715 = vmatpush1.msra.mxu0 %v667_v54  ;;  %v664_v57 = vld [vmem:[#allocation2 + $0x48] sm:$0xff]  ;;  %v663_v58 = vld [vmem:[#allocation2 + $0x40] sm:$0xff] }
 0x34b   :  { %716 = vmatprep.subr.mxu0 %v666_v55 }
 0x34c   :  { %3728 = vrsqrt.f32 %v467_v59  ;;  %717 = vmatpush1.msra.mxu0 %v665_v56  ;;  %v662_v59 = vld [vmem:[#allocation2 + $0x38] sm:$0xff] }
 0x34d   :  { %718 = vmatprep.subr.mxu0 %v664_v57 }
 0x34e   :  { %719 = vmatpush1.msra.mxu0 %v663_v58 }
 0x34f   :  { %720 = vmatprep.subr.mxu0 %v662_v59 }
 0x353   :  { %v3723_v60 = vpop.eup %3722 }
 0x354   :  { %v474_v61 = vmul.f32 %v3723_v60, %v4036_v29  ;;  %v661_v60 = vld [vmem:[#allocation2 + $0x30] sm:$0xff] }
 0x355   :  { %v3725_v63 = vpop.eup %3724  ;;  %721 = vmatpush1.msra.mxu0 %v661_v60 }
 0x356   :  { %v473_v0 = vmul.f32 %v3725_v63, %v4043_v32  ;;  %v479_v3 = vmul.f32 %v477_v62, %v474_v61  ;;  %v660_v61 = vld [vmem:[#allocation2 + $0x28] sm:$0xff]  ;;  %v658_v63 = vld [vmem:[#allocation2 + $0x18] sm:$0xff] }
 0x357   :  { %v3727_v1 = vpop.eup %3726  ;;  %722 = vmatprep.subr.mxu0 %v660_v61 }
 0x358   :  { %v478_v4 = vmul.f32 %v477_v62, %v473_v0  ;;  %v476_v8 = vmul.f32 %v3727_v1, %v4034_v27  ;;  %v484_v13 = vadd.f32 %v482_v6, %v479_v3  ;;  %v657_v0 = vld [vmem:[#allocation2 + $0x10] sm:$0xff]  ;;  %v656_v1 = vld [vmem:[#allocation2 + $0x8] sm:$0xff]  ;;  %v655_v3 = vld [vmem:[#allocation2] sm:$0xff] }
 0x359   :  { %v3729_v10 = vpop.eup %3728 }
 0x35a   :  { %v483_v11 = vadd.f32 %v482_v6, %v478_v4  ;;  %v475_v12 = vmul.f32 %v3729_v10, %v4039_v30  ;;  %v481_v14 = vmul.f32 %v477_v62, %v476_v8  ;;  %v3898_v4 = vmov 0.0  }
 0x35b   :  { %760 = vmatprep.mubr.f32.mxu0 %v3898_v4 }
 0x35c   :  { %3407 = vmatprep.mubr.msk.f32.mxu1 %vm169_vm1, %v483_v11  ;;  %v480_v15 = vmul.f32 %v477_v62, %v475_v12  ;;  %v486_v17 = vadd.f32 %v482_v6, %v481_v14  ;;  %v659_v62 = vld [vmem:[#allocation2 + $0x20] sm:$0xff] }
 0x35d   :  { %3408 = vmatmul.mubr.msk.f32.vlgmr.msra.gmra.mxu1 %vm169_vm1, %v484_v13  ;;  %723 = vmatpush1.msra.mxu0 %v659_v62 }
 0x35e   :  { %v485_v16 = vadd.f32 %v482_v6, %v480_v15  ;;  %724 = vmatprep.subr.mxu0 %v658_v63 }
 0x35f   :  { %725 = vmatpush1.msra.mxu0 %v657_v0 }
 0x360   :  { %3410 = vmatprep.mubr.msk.f32.mxu1 %vm169_vm1, %v485_v16  ;;  %726 = vmatprep.subr.mxu0 %v656_v1 }
 0x361   :  { %3411 = vmatmul.mubr.msk.f32.gmra.mxu1 %vm169_vm1, %v486_v17  ;;  %727 = vmatpush1.msra.mxu0 %v655_v3 }
 0x41d   :  { %v3409_v18 = vpop.f32.mrf.mxu1 }
 0x41e   :  { %v4108_v23 = vadd.f32 %v3409_v18, %v496_v19 }
 0x41f   :  { %v575_v20 = vpop.f32.mrf.mxu1 }
 0x420   :  { %v4106_v21 = vadd.f32 %v575_v20, %v496_v19  ;;  %v605_v28 = vsel %vm169_vm1, %v4108_v23, 0.0 }
 0x421   :  { %v3412_v22 = vpop.f32.mrf.mxu1 }
 0x422   :  { %v602_v24 = vsel %vm169_vm1, %v4106_v21, 0.0  ;;  %v4114_v27 = vadd.f32 %v3412_v22, %v496_v19 }
 0x423   :  { %603 = vadd.xlane.f32.xlu0 %v602_v24  ;;  %v585_v25 = vpop.f32.mrf.mxu1 }
 0x424   :  { %v4112_v26 = vadd.f32 %v585_v25, %v496_v19  ;;  %v611_v30 = vsel %vm169_vm1, %v4114_v27, 0.0 }
 0x426   :  { %v608_v29 = vsel %vm169_vm1, %v4112_v26, 0.0 }
 0x427   :  { %606 = vadd.xlane.f32.xlu0 %v605_v28  ;;  %609 = vadd.xlane.f32.xlu1 %v608_v29 }
 0x42b   :  { %612 = vadd.xlane.f32.xlu1 %v611_v30 }
 0x4ac   :  { %v604_v31 = vpop.xlane.xlu0 %603 }
 0x4ad   :  { %v615_v32 = vmul.f32 0.015625, %v604_v31 }
 0x4af   :  { %v4123_v33 = vsub.f32 %v4106_v21, %v615_v32  ;;  %v674_v32 = vlaneseq }
 0x4b0   :  { %v607_v34 = vpop.xlane.xlu0 %606  ;;  %v610_v35 = vpop.xlane.xlu1 %609 }
 0x4b1   :  { %v616_v36 = vmul.f32 0.015625, %v607_v34  ;;  %v617_v37 = vmul.f32 0.015625, %v610_v35  ;;  %v623_v38 = vmul.f32 %v4123_v33, %v4123_v33  ;;  %v2985_v35 = vld [vmem:[%s4716_s6 + $0x4] ss:$8 sm:$0x3] }
 0x4b3   :  { %v4128_v39 = vsub.f32 %v4108_v23, %v616_v36  ;;  %v4131_v40 = vsub.f32 %v4112_v26, %v617_v37  ;;  %v627_v41 = vsel %vm169_vm1, %v623_v38, 0.0 }
 0x4b4   :  { %628 = vadd.xlane.f32.xlu0 %v627_v41  ;;  %v613_v42 = vpop.xlane.xlu1 %612 }
 0x4b5   :  { %v618_v43 = vmul.f32 0.015625, %v613_v42  ;;  %v624_v44 = vmul.f32 %v4128_v39, %v4128_v39  ;;  %v625_v45 = vmul.f32 %v4131_v40, %v4131_v40 }
 0x4b7   :  { %v4139_v46 = vsub.f32 %v4114_v27, %v618_v43  ;;  %v630_v47 = vsel %vm169_vm1, %v624_v44, 0.0  ;;  %v633_v48 = vsel %vm169_vm1, %v625_v45, 0.0 }
 0x4b8   :  { %631 = vadd.xlane.f32.xlu1 %v630_v47  ;;  %634 = vadd.xlane.f32.xlu0 %v633_v48 }
 0x4b9   :  { %v626_v49 = vmul.f32 %v4139_v46, %v4139_v46 }
 0x4bb   :  { %v636_v50 = vsel %vm169_vm1, %v626_v49, 0.0 }
 0x4bc   :  { %637 = vadd.xlane.f32.xlu1 %v636_v50 }
 0x53d   :  { %v629_v6 = vpop.xlane.xlu0 %628 }
 0x53e   :  { %v639_v8 = vmul.f32 0.015625, %v629_v6  ;;  %v2982_v6 = vadd.f32 -1.0, %v3980_v5 }
 0x540   :  { %v643_v10 = vadd.f32 1e-05, %v639_v8  ;;  %v2981_v8 = vadd.f32 -1.0, %v3963_v2 }
 0x541   :  { %v635_v11 = vpop.xlane.xlu0 %634  ;;  %v632_v12 = vpop.xlane.xlu1 %631 }
 0x542   :  { %3730 = vrsqrt.f32 %v643_v10  ;;  %v641_v13 = vmul.f32 0.015625, %v635_v11  ;;  %v640_v14 = vmul.f32 0.015625, %v632_v12  ;;  %v4226_v10 = vmul.f32 1e+30, %v2982_v6 }
 0x543   :  { %v2984_v11 = vadd.f32 -1.0, %v4005_v9 }
 0x544   :  { %v644_v15 = vadd.f32 1e-05, %v640_v14  ;;  %v645_v16 = vadd.f32 1e-05, %v641_v13  ;;  %v4229_v13 = vmul.f32 1e+30, %v2981_v8 }
 0x545   :  { %v638_v17 = vpop.xlane.xlu1 %637 }
 0x546   :  { %v642_v18 = vmul.f32 0.015625, %v638_v17  ;;  %3732 = vrsqrt.f32 %v644_v15  ;;  %v4232_v17 = vmul.f32 1e+30, %v2984_v11 }
 0x547   :  { %3734 = vrsqrt.f32 %v645_v16  ;;  %v2983_v16 = vadd.f32 -1.0, %v3990_v7 }
 0x548   :  { %v646_v19 = vadd.f32 1e-05, %v642_v18 }
 0x54a   :  { %3736 = vrsqrt.f32 %v646_v19 }
 0x54f   :  { %v3731_v20 = vpop.eup %3730 }
 0x550   :  { %v651_v22 = vmul.f32 %v3731_v20, %v4123_v33  ;;  %v4158_v33 = vshrl.u32 %v674_v32, 7 }
 0x552   :  { %2986 = vmatmul.mubr.msk.f32.vlgmr.msra.gmra.mxu0 %vm169_vm1, %v651_v22  ;;  %v676_v34 = vsub.s32 0, %v4158_v33  ;;  %v680_v53 = vsub.s32 1, %v4158_v33 }
 0x553   :  { %766 = vmatprep.mubr.f32.mxu0 %v3898_v4  ;;  %v3733_v24 = vpop.eup %3732 }
 0x554   :  { %v652_v25 = vmul.f32 %v3733_v24, %v4128_v39  ;;  %v3735_v28 = vpop.eup %3734  ;;  %v677_v36 = vrot.slane %v2985_v35, %v676_v34  ;;  %v681_v57 = vrot.slane %v2985_v35, %v680_v53 }
 0x555   :  { %v653_v29 = vmul.f32 %v3735_v28, %v4131_v40  ;;  %v4237_v28 = vmul.f32 1e+30, %v2983_v16 }
 0x556   :  { %2987 = vmatmul.mubr.msk.f32.gmra.mxu0 %vm169_vm1, %v652_v25 }
 0x557   :  { %772 = vmatprep.mubr.f32.mxu0 %v3898_v4  ;;  %v3737_v30 = vpop.eup %3736 }
 0x558   :  { %v654_v31 = vmul.f32 %v3737_v30, %v4139_v46 }
 0x55a   :  { %2988 = vmatmul.mubr.msk.f32.gmra.mxu0 %vm169_vm1, %v653_v29 }
 0x55b   :  { %778 = vmatprep.mubr.f32.mxu0 %v3898_v4 }
 0x55e   :  { %2989 = vmatmul.mubr.msk.f32.gmra.mxu0 %vm169_vm1, %v654_v31 }
 0x612   :  { %v762_v37 = vpop.f32.mrf.mxu0 }
 0x613   :  { %v763_v38 = vadd.f32 %v762_v37, %v677_v36 }
 0x614   :  { %v4166_v39 = vpop.f32.mrf.mxu0 }
 0x615   :  { %3421 = vmatprep.mubr.msk.f32.mxu1 %vm71_vm0, %v763_v38  ;;  %v4214_v0 = vadd.f32 %v4166_v39, %v681_v57 }
 0x616   :  { %v768_v40 = vpop.f32.mrf.mxu0 }
 0x617   :  { %v769_v46 = vadd.f32 %v768_v40, %v677_v36 }
 0x618   :  { %v770_v41 = vpop.f32.mrf.mxu0 }
 0x619   :  { %v4208_v62 = vadd.f32 %v770_v41, %v681_v57 }
 0x61a   :  { %v774_v42 = vpop.f32.mrf.mxu0 }
 0x61b   :  { %v775_v43 = vadd.f32 %v774_v42, %v677_v36 }
 0x61c   :  { %v776_v44 = vpop.f32.mrf.mxu0 }
 0x61d   :  { %793 = vrot.lane.b32.xlu1 %v775_v43, %s3899_s4  ;;  %v4203_v61 = vadd.f32 %v776_v44, %v681_v57 }
 0x61e   :  { %v780_v45 = vpop.f32.mrf.mxu0 }
 0x61f   :  { %v781_v47 = vadd.f32 %v780_v45, %v677_v36 }
 0x620   :  { %v782_v56 = vpop.f32.mrf.mxu0 }
 0x621   :  { %791 = vrot.lane.b32.xlu1 %v769_v46, %s3899_s4  ;;  %795 = vrot.lane.b32.xlu0 %v781_v47, %s3899_s4  ;;  %v4196_v59 = vadd.f32 %v782_v56, %v681_v57 }
 0x625   :  { %1061 = vrot.lane.b32.xlu1 %v781_v47, %s3900_s20  ;;  %789 = vrot.lane.b32.xlu0 %v763_v38, %s3899_s4 }
 0x629   :  { %1059 = vrot.lane.b32.xlu1 %v775_v43, %s3900_s20  ;;  %1057 = vrot.lane.b32.xlu0 %v769_v46, %s3900_s20 }
 0x62d   :  { %1055 = vrot.lane.b32.xlu1 %v763_v38, %s3900_s20  ;;  %1047 = vrot.lane.b32.xlu0 %v763_v38, %s3901_s21 }
 0x631   :  { %1049 = vrot.lane.b32.xlu1 %v769_v46, %s3901_s21  ;;  %1051 = vrot.lane.b32.xlu0 %v775_v43, %s3901_s21 }
 0x635   :  { %1053 = vrot.lane.b32.xlu1 %v781_v47, %s3901_s21 }
 0x68f   :  { %v794_v48 = vpop.permute.xlu1 %793 }
 0x693   :  { %v796_v49 = vpop.permute.xlu0 %795  ;;  %v792_v50 = vpop.permute.xlu1 %791 }
 0x694   :  { %3413 = vmatprep.subr.msk.mxu1 %vm71_vm0, %v796_v49 }
 0x695   :  { %3414 = vmatpush3.xpose.msk.msra.mxu1 %vm71_vm0, %v796_v49 }
 0x696   :  { %3415 = vmatprep.subr.msk.mxu1 %vm71_vm0, %v794_v48 }
 0x697   :  { %v790_v51 = vpop.permute.xlu0 %789  ;;  %v1062_v52 = vpop.permute.xlu1 %1061 }
 0x698   :  { %3441 = vmatprep.subr.msk.mxu0 %vm71_vm0, %v1062_v52 }
 0x699   :  { %3416 = vmatpush3.xpose.msk.msra.mxu1 %vm71_vm0, %v794_v48  ;;  %3442 = vmatpush3.xpose.msk.msra.mxu0 %vm71_vm0, %v1062_v52 }
 0x69a   :  { %3417 = vmatprep.subr.msk.mxu1 %vm71_vm0, %v792_v50 }
 0x69b   :  { %v1058_v54 = vpop.permute.xlu0 %1057  ;;  %v1060_v55 = vpop.permute.xlu1 %1059 }
 0x69c   :  { %3443 = vmatprep.subr.msk.mxu0 %vm71_vm0, %v1060_v55 }
 0x69d   :  { %3418 = vmatpush3.xpose.msk.msra.mxu1 %vm71_vm0, %v792_v50  ;;  %3444 = vmatpush3.xpose.msk.msra.mxu0 %vm71_vm0, %v1060_v55 }
 0x69e   :  { %3419 = vmatprep.subr.msk.mxu1 %vm71_vm0, %v790_v51  ;;  %3445 = vmatprep.subr.msk.mxu0 %vm71_vm0, %v1058_v54 }
 0x69f   :  { %v1048_v58 = vpop.permute.xlu0 %1047  ;;  %v1056_v60 = vpop.permute.xlu1 %1055 }
 0x6a0   :  { %3449 = vmatprep.mubr.msk.f32.mxu0 %vm71_vm0, %v1048_v58 }
 0x6a1   :  { %3420 = vmatpush3.xpose.msk.msra.mxu1 %vm71_vm0, %v790_v51  ;;  %3446 = vmatpush3.xpose.msk.msra.mxu0 %vm71_vm0, %v1058_v54 }
 0x6a2   :  { %3427 = vmatprep.subr.mxu1 %v4196_v59  ;;  %3447 = vmatprep.subr.msk.mxu0 %vm71_vm0, %v1056_v60 }
 0x6a3   :  { %v1050_v63 = vpop.permute.xlu1 %1049  ;;  %v1052_v1 = vpop.permute.xlu0 %1051 }
 0x6a4   :  { %3422 = vmatmul.mubr.msk.f32.vlgmr.msra.gmra.mxu1 %vm71_vm0, %v769_v46 }
 0x6a5   :  { %3424 = vmatprep.mubr.msk.f32.mxu1 %vm71_vm0, %v775_v43  ;;  %3428 = vmatpush3.msra.mxu1 %v4196_v59 }
 0x6a6   :  { %3448 = vmatpush3.xpose.msk.msra.mxu0 %vm71_vm0, %v1056_v60  ;;  %3429 = vmatprep.subr.mxu1 %v4203_v61 }
 0x6a7   :  { %3430 = vmatpush3.msra.mxu1 %v4203_v61  ;;  %v1054_v3 = vpop.permute.xlu1 %1053 }
 0x6a8   :  { %3425 = vmatmul.mubr.msk.f32.gmra.mxu1 %vm71_vm0, %v781_v47  ;;  %3431 = vmatprep.subr.mxu1 %v4208_v62 }
 0x6a9   :  { %3450 = vmatmul.mubr.msk.f32.vlgmr.msra.gmra.mxu0 %vm71_vm0, %v1050_v63  ;;  %3432 = vmatpush3.msra.mxu1 %v4208_v62 }
 0x6aa   :  { %3452 = vmatprep.mubr.msk.f32.mxu0 %vm71_vm0, %v1052_v1  ;;  %3433 = vmatprep.subr.mxu1 %v4214_v0 }
 0x6ab   :  { %3434 = vmatpush3.msra.mxu1 %v4214_v0 }
 0x6ad   :  { %3453 = vmatmul.mubr.msk.f32.gmra.mxu0 %vm71_vm0, %v1054_v3 }
 0x764   :  { %v3423_v12 = vpop.f32.mrf.mxu1 }
 0x765   :  { %v899_v14 = vmul.f32 0.17677669, %v3423_v12 }
 0x766   :  { %v879_v15 = vpop.f32.mrf.mxu1 }
 0x767   :  { %v898_v18 = vmul.f32 0.17677669, %v879_v15  ;;  %v903_v19 = vadd.f32 %v899_v14, %v4226_v10 }
 0x768   :  { %v3426_v20 = vpop.f32.mrf.mxu1 }
 0x769   :  { %v901_v5 = vmul.f32 0.17677669, %v3426_v20  ;;  %v3451_v22 = vpop.f32.mrf.mxu0  ;;  %v909_v2 = vsel %vm71_vm0, %v903_v19, -inf  ;;  %v902_v24 = vadd.f32 %v898_v18, %v4229_v13 }
 0x76a   :  { %v1165_v9 = vmul.f32 0.17677669, %v3451_v22  ;;  %910 = vmax.xlane.f32.xlu1 %v909_v2  ;;  %v889_v25 = vpop.f32.mrf.mxu1 }
 0x76b   :  { %v900_v29 = vmul.f32 0.17677669, %v889_v25  ;;  %v1145_v30 = vpop.f32.mrf.mxu0  ;;  %v906_v7 = vsel %vm71_vm0, %v902_v24, -inf  ;;  %v905_v31 = vadd.f32 %v901_v5, %v4232_v17 }
 0x76c   :  { %907 = vmax.xlane.f32.xlu0 %v906_v7  ;;  %v1169_v32 = vadd.f32 %v1165_v9, %v4226_v10  ;;  %v1164_v38 = vmul.f32 0.17677669, %v1145_v30 }
 0x76d   :  { %v3454_v35 = vpop.f32.mrf.mxu0  ;;  %v915_v39 = vsel %vm71_vm0, %v905_v31, -inf  ;;  %v904_v40 = vadd.f32 %v900_v29, %v4237_v28 }
 0x76e   :  { %v1167_v36 = vmul.f32 0.17677669, %v3454_v35  ;;  %v1175_v37 = vsel %vm71_vm0, %v1169_v32, -inf  ;;  %v1168_v46 = vadd.f32 %v1164_v38, %v4229_v13 }
 0x76f   :  { %1176 = vmax.xlane.f32.xlu1 %v1175_v37  ;;  %v1155_v41 = vpop.f32.mrf.mxu0  ;;  %v912_v45 = vsel %vm71_vm0, %v904_v40, -inf }
 0x770   :  { %916 = vmax.xlane.f32.xlu0 %v915_v39  ;;  %v1171_v42 = vadd.f32 %v1167_v36, %v4232_v17  ;;  %v1166_v44 = vmul.f32 0.17677669, %v1155_v41  ;;  %v1172_v47 = vsel %vm71_vm0, %v1168_v46, -inf }
 0x772   :  { %v1181_v43 = vsel %vm71_vm0, %v1171_v42, -inf  ;;  %v1170_v48 = vadd.f32 %v1166_v44, %v4237_v28 }
 0x773   :  { %1182 = vmax.xlane.f32.xlu1 %v1181_v43 }
 0x774   :  { %913 = vmax.xlane.f32.xlu0 %v912_v45  ;;  %v1178_v49 = vsel %vm71_vm0, %v1170_v48, -inf }
 0x778   :  { %1173 = vmax.xlane.f32.xlu0 %v1172_v47 }
 0x77c   :  { %1179 = vmax.xlane.f32.xlu0 %v1178_v49 }
 0x7f3   :  { %v911_v50 = vpop.xlane.xlu1 %910 }
 0x7f4   :  { %v919_v51 = vsub.f32 %v903_v19, %v911_v50 }
 0x7f5   :  { %v908_v52 = vpop.xlane.xlu0 %907 }
 0x7f6   :  { %v924_v54 = vmul.f32 1.442695, %v919_v51  ;;  %v918_v55 = vsub.f32 %v902_v24, %v908_v52 }
 0x7f8   :  { %3738 = vpow2.f32 %v924_v54  ;;  %v922_v56 = vmul.f32 1.442695, %v918_v55  ;;  %v1177_v57 = vpop.xlane.xlu1 %1176 }
 0x7f9   :  { %v1185_v58 = vsub.f32 %v1169_v32, %v1177_v57  ;;  %v917_v60 = vpop.xlane.xlu0 %916 }
 0x7fa   :  { %3740 = vpow2.f32 %v922_v56  ;;  %v921_v63 = vsub.f32 %v905_v31, %v917_v60 }
 0x7fb   :  { %v1190_v1 = vmul.f32 1.442695, %v1185_v58 }
 0x7fc   :  { %v928_v3 = vmul.f32 1.442695, %v921_v63  ;;  %v1183_v6 = vpop.xlane.xlu1 %1182 }
 0x7fd   :  { %3742 = vpow2.f32 %v1190_v1  ;;  %v1187_v8 = vsub.f32 %v1171_v42, %v1183_v6  ;;  %v914_v11 = vpop.xlane.xlu0 %913 }
 0x7fe   :  { %3744 = vpow2.f32 %v928_v3  ;;  %v920_v14 = vsub.f32 %v904_v40, %v914_v11 }
 0x7ff   :  { %v1194_v12 = vmul.f32 1.442695, %v1187_v8 }
 0x800   :  { %v926_v18 = vmul.f32 1.442695, %v920_v14  ;;  %v3021_v14 = vld [vmem:[%s4712_s2 + $0xf8] sm:$0xff] }
 0x801   :  { %v1174_v15 = vpop.xlane.xlu0 %1173  ;;  %3746 = vpow2.f32 %v1194_v12  ;;  %3469 = vmatprep.subr.mxu0 %v3021_v14 }
 0x802   :  { %v1184_v16 = vsub.f32 %v1168_v46, %v1174_v15  ;;  %v3020_v15 = vld [vmem:[%s4712_s2 + $0xf0] sm:$0xff]  ;;  %3470 = vmatpush3.msra.mxu0 %v3021_v14  ;;  %v1606_v14 = vld [vmem:[%s4715_s5 + $0x20] sm:$0xff] }
 0x803   :  { %3471 = vmatprep.subr.mxu0 %v3020_v15 }
 0x804   :  { %v1188_v19 = vmul.f32 1.442695, %v1184_v16  ;;  %v3019_v16 = vld [vmem:[%s4712_s2 + $0xe8] sm:$0xff]  ;;  %3472 = vmatpush3.msra.mxu0 %v3020_v15  ;;  %v1605_v15 = vld [vmem:[%s4715_s5 + $0x18] sm:$0xff] }
 0x805   :  { %v3739_v20 = vpop.eup %3738  ;;  %v1180_v5 = vpop.xlane.xlu0 %1179  ;;  %3473 = vmatprep.subr.mxu0 %v3019_v16 }
 0x806   :  { %3748 = vpow2.f32 %v1188_v19  ;;  %v1186_v22 = vsub.f32 %v1170_v48, %v1180_v5  ;;  %v933_v2 = vsel %vm71_vm0, %v3739_v20, 0.0  ;;  %3474 = vmatpush3.msra.mxu0 %v3019_v16  ;;  %v3017_v19 = vld [vmem:[%s4712_s2 + $0xd8] sm:$0xff]  ;;  %v3015_v5 = vld [vmem:[%s4712_s2 + $0xc8] sm:$0xff]  ;;  %v1604_v16 = vld [vmem:[%s4715_s5 + $0x10] sm:$0xff] }
 0x807   :  { %v3741_v24 = vpop.eup %3740  ;;  %934 = vadd.xlane.f32.xlu1 %v933_v2  ;;  %3750 = vpow2.f32 %v926_v18  ;;  %v3018_v18 = vld [vmem:[%s4712_s2 + $0xe0] sm:$0xff] }
 0x808   :  { %v1192_v9 = vmul.f32 1.442695, %v1186_v22  ;;  %v930_v25 = vsel %vm71_vm0, %v3741_v24, 0.0  ;;  %3475 = vmatprep.subr.mxu0 %v3018_v18  ;;  %v3014_v2 = vld [vmem:[%s4712_s2 + $0xc0] sm:$0xff] }
 0x809   :  { %931 = vadd.xlane.f32.xlu0 %v930_v25  ;;  %3476 = vmatpush3.msra.mxu0 %v3018_v18  ;;  %v1467_v25 = vld [vmem:[#allocation5 + $0x38] sm:$0xff]  ;;  %v1603_v18 = vld [vmem:[%s4715_s5 + $0x8] sm:$0xff] }
 0x80a   :  { %v4254_v29 = vpop.eup %3742  ;;  %3752 = vpow2.f32 %v1192_v9  ;;  %3477 = vmatprep.subr.mxu0 %v3017_v19 }
 0x80b   :  { %v1199_v30 = vsel %vm71_vm0, %v4254_v29, 0.0  ;;  %v3745_v7 = vpop.eup %3744  ;;  %3478 = vmatpush3.msra.mxu0 %v3017_v19  ;;  %v1602_v19 = vld [vmem:[%s4715_s5] sm:$0xff] }
 0x80c   :  { %1200 = vadd.xlane.f32.xlu1 %v1199_v30  ;;  %v939_v31 = vsel %vm71_vm0, %v3745_v7, 0.0 }
 0x80e   :  { %v4259_v32 = vpop.eup %3746 }
 0x80f   :  { %v1205_v36 = vsel %vm71_vm0, %v4259_v32, 0.0 }
 0x810   :  { %940 = vadd.xlane.f32.xlu1 %v939_v31 }
 0x813   :  { %v3749_v35 = vpop.eup %3748 }
 0x814   :  { %1206 = vadd.xlane.f32.xlu1 %v1205_v36  ;;  %v1196_v37 = vsel %vm71_vm0, %v3749_v35, 0.0  ;;  %v3751_v38 = vpop.eup %3750 }
 0x815   :  { %1197 = vadd.xlane.f32.xlu0 %v1196_v37  ;;  %v936_v39 = vsel %vm71_vm0, %v3751_v38, 0.0 }
 0x817   :  { %v3753_v40 = vpop.eup %3752 }
 0x818   :  { %v1202_v41 = vsel %vm71_vm0, %v3753_v40, 0.0 }
 0x819   :  { %937 = vadd.xlane.f32.xlu0 %v936_v39 }
 0x81d   :  { %1203 = vadd.xlane.f32.xlu0 %v1202_v41 }
 0x825   :  { %1224 = vrot.lane.b32.xlu1 %v4203_v61, %s3901_s21 }
 0x829   :  { %1222 = vrot.lane.b32.xlu1 %v4208_v62, %s3901_s21 }
 0x82d   :  { %1220 = vrot.lane.b32.xlu1 %v4214_v0, %s3901_s21 }
 0x833   :  { %1226 = vrot.lane.b32.xlu0 %v4196_v59, %s3901_s21 }
 0x890   :  { %v935_v42 = vpop.xlane.xlu1 %934 }
 0x891   :  { %3754 = vrcp.f32 %v935_v42 }
 0x892   :  { %v932_v43 = vpop.xlane.xlu0 %931 }
 0x893   :  { %3756 = vrcp.f32 %v932_v43 }
 0x895   :  { %v1201_v44 = vpop.xlane.xlu1 %1200 }
 0x899   :  { %v941_v45 = vpop.xlane.xlu1 %940 }
 0x89a   :  { %3758 = vrcp.f32 %v941_v45 }
 0x89d   :  { %v1207_v46 = vpop.xlane.xlu1 %1206 }
 0x89e   :  { %v1198_v47 = vpop.xlane.xlu0 %1197  ;;  %v3755_v48 = vpop.eup %3754 }
 0x89f   :  { %v945_v50 = vmul.f32 %v3755_v48, %v3739_v20  ;;  %3760 = vrcp.f32 %v1198_v47  ;;  %v3016_v20 = vld [vmem:[%s4712_s2 + $0xd0] sm:$0xff]  ;;  %v1461_v48 = vld [vmem:[#allocation5 + $0x8] sm:$0xff] }
 0x8a0   :  { %v3757_v49 = vpop.eup %3756  ;;  %3479 = vmatprep.subr.mxu0 %v3016_v20  ;;  %v1462_v47 = vld [vmem:[#allocation5 + $0x10] sm:$0xff] }
 0x8a1   :  { %v943_v61 = vmul.f32 %v3757_v49, %v3741_v24  ;;  %v1225_v0 = vpop.permute.xlu1 %1224  ;;  %3480 = vmatpush3.msra.mxu0 %v3016_v20  ;;  %v1460_v49 = vld [vmem:[#allocation5] sm:$0xff] }
 0x8a2   :  { %v938_v62 = vpop.xlane.xlu0 %937  ;;  %3481 = vmatprep.subr.mxu0 %v3015_v5  ;;  %v1468_v20 = vld [vmem:[%s4716_s6 + $0x6] ss:$0 sm:$0xff] }
 0x8a3   :  { %3762 = vrcp.f32 %v938_v62  ;;  %3435 = vmatprep.mubr.msk.f32.mxu1 %vm71_vm0, %v943_v61  ;;  %3482 = vmatpush3.msra.mxu0 %v3015_v5  ;;  %v1358_v61 = vld [vmem:[%s4716_s6 + $0x5] ss:$0 sm:$0xff] }
 0x8a4   :  { %3436 = vmatmul.mubr.msk.f32.vlgmr.msra.gmra.mxu1 %vm71_vm0, %v945_v50  ;;  %3764 = vrcp.f32 %v1201_v44  ;;  %3483 = vmatprep.subr.mxu0 %v3014_v2 }
 0x8a5   :  { %v1223_v51 = vpop.permute.xlu1 %1222  ;;  %3484 = vmatpush3.msra.mxu0 %v3014_v2 }
 0x8a6   :  { %v1204_v59 = vpop.xlane.xlu0 %1203 }
 0x8a7   :  { %3766 = vrcp.f32 %v1204_v59  ;;  %v3759_v54 = vpop.eup %3758 }
 0x8a8   :  { %3768 = vrcp.f32 %v1207_v46  ;;  %v949_v60 = vmul.f32 %v3759_v54, %v3745_v7  ;;  %v1465_v7 = vld [vmem:[#allocation5 + $0x28] sm:$0xff]  ;;  %v1463_v46 = vld [vmem:[#allocation5 + $0x18] sm:$0xff] }
 0x8a9   :  { %v1221_v57 = vpop.permute.xlu1 %1220 }
 0x8aa   :  { %v1227_v52 = vpop.permute.xlu0 %1226 }
 0x8ab   :  { %3455 = vmatprep.subr.mxu1 %v1227_v52 }
 0x8ac   :  { %3456 = vmatpush3.msra.mxu1 %v1227_v52  ;;  %v3761_v55 = vpop.eup %3760 }
 0x8ad   :  { %3457 = vmatprep.subr.mxu1 %v1225_v0  ;;  %v1209_v1 = vmul.f32 %v3761_v55, %v3749_v35 }
 0x8ae   :  { %3458 = vmatpush3.msra.mxu1 %v1225_v0 }
 0x8af   :  { %3459 = vmatprep.subr.mxu1 %v1223_v51 }
 0x8b0   :  { %v3763_v56 = vpop.eup %3762  ;;  %3460 = vmatpush3.msra.mxu1 %v1223_v51 }
 0x8b1   :  { %3461 = vmatprep.subr.mxu1 %v1221_v57  ;;  %v947_v58 = vmul.f32 %v3763_v56, %v3751_v38  ;;  %v3765_v63 = vpop.eup %3764 }
 0x8b2   :  { %3462 = vmatpush3.msra.mxu1 %v1221_v57  ;;  %v1211_v6 = vmul.f32 %v3765_v63, %v4254_v29  ;;  %v1466_v29 = vld [vmem:[#allocation5 + $0x30] sm:$0xff]  ;;  %v1613_v63 = vld [vmem:[%s4715_s5 + $0x58] sm:$0xff] }
 0x8b3   :  { %3438 = vmatprep.mubr.msk.f32.mxu1 %vm71_vm0, %v947_v58  ;;  %3491 = vmatprep.subr.mxu1 %v1467_v25 }
 0x8b4   :  { %v3767_v3 = vpop.eup %3766  ;;  %3439 = vmatmul.mubr.msk.f32.gmra.mxu1 %vm71_vm0, %v949_v60 }
 0x8b5   :  { %3463 = vmatprep.mubr.msk.f32.mxu1 %vm71_vm0, %v1209_v1  ;;  %v3769_v8 = vpop.eup %3768  ;;  %v1213_v11 = vmul.f32 %v3767_v3, %v3753_v40  ;;  %v1612_v1 = vld [vmem:[%s4715_s5 + $0x50] sm:$0xff]  ;;  %v1611_v3 = vld [vmem:[%s4715_s5 + $0x48] sm:$0xff] }
 0x8b6   :  { %v1215_v12 = vmul.f32 %v3769_v8, %v4259_v32  ;;  %v1464_v32 = vld [vmem:[#allocation5 + $0x20] sm:$0xff]  ;;  %v1609_v8 = vld [vmem:[%s4715_s5 + $0x38] sm:$0xff] }
 0x8b8   :  { %3464 = vmatmul.mubr.msk.f32.vlgmr.msra.gmra.mxu1 %vm71_vm0, %v1211_v6  ;;  %v1610_v6 = vld [vmem:[%s4715_s5 + $0x40] sm:$0xff] }
 0x8b9   :  { %3466 = vmatprep.mubr.msk.f32.mxu1 %vm71_vm0, %v1213_v11  ;;  %3492 = vmatpush3.msra.mxu1 %v1467_v25  ;;  %v1608_v11 = vld [vmem:[%s4715_s5 + $0x30] sm:$0xff] }
 0x8ba   :  { %3493 = vmatprep.subr.mxu1 %v1466_v29 }
 0x8bb   :  { %3494 = vmatpush3.msra.mxu1 %v1466_v29 }
 0x8bc   :  { %3467 = vmatmul.mubr.msk.f32.gmra.mxu1 %vm71_vm0, %v1215_v12  ;;  %3495 = vmatprep.subr.mxu1 %v1465_v7  ;;  %v1607_v12 = vld [vmem:[%s4715_s5 + $0x28] sm:$0xff] }
 0x8bd   :  { %3496 = vmatpush3.msra.mxu1 %v1465_v7 }
 0x8be   :  { %3497 = vmatprep.subr.mxu1 %v1464_v32 }
 0x8bf   :  { %3498 = vmatpush3.msra.mxu1 %v1464_v32 }
 0x8c0   :  { %3499 = vmatprep.subr.mxu1 %v1463_v46 }
 0x8c1   :  { %3500 = vmatpush3.msra.mxu1 %v1463_v46 }
 0x8c2   :  { %3501 = vmatprep.subr.mxu1 %v1462_v47 }
 0x8c3   :  { %3502 = vmatpush3.msra.mxu1 %v1462_v47 }
 0x8c4   :  { %3503 = vmatprep.subr.mxu1 %v1461_v48 }
 0x8c5   :  { %3504 = vmatpush3.msra.mxu1 %v1461_v48 }
 0x8c6   :  { %3505 = vmatprep.subr.mxu1 %v1460_v49 }
 0x8c7   :  { %3506 = vmatpush3.msra.mxu1 %v1460_v49 }
 0x964   :  { %v3437_v22 = vpop.f32.mrf.mxu1 }
 0x966   :  { %v1028_v24 = vpop.f32.mrf.mxu1 }
 0x974   :  { %v3440_v9 = vpop.f32.mrf.mxu1 }
 0x976   :  { %v1038_v30 = vpop.f32.mrf.mxu1 }
 0x978   :  { %v3465_v31 = vpop.f32.mrf.mxu1 }
 0x979   :  { %1335 = vrot.lane.b32.xlu1 %v3465_v31, %s3900_s20 }
 0x97a   :  { %v1310_v35 = vpop.f32.mrf.mxu1 }
 0x97b   :  { %1333 = vrot.lane.b32.xlu0 %v1310_v35, %s3900_s20 }
 0x97c   :  { %v3468_v36 = vpop.f32.mrf.mxu1 }
 0x97d   :  { %1339 = vrot.lane.b32.xlu1 %v3468_v36, %s3900_s20 }
 0x97e   :  { %v1320_v37 = vpop.f32.mrf.mxu1 }
 0x97f   :  { %1337 = vrot.lane.b32.xlu0 %v1320_v37, %s3900_s20 }
 0x9eb   :  { %v1336_v38 = vpop.permute.xlu1 %1335 }
 0x9ec   :  { %v1346_v41 = vsel %vm71_vm0, %v3437_v22, %v1336_v38 }
 0x9ed   :  { %v1334_v39 = vpop.permute.xlu0 %1333 }
 0x9ee   :  { %v1345_v40 = vsel %vm71_vm0, %v1028_v24, %v1334_v39 }
 0x9ef   :  { %3485 = vmatprep.mubr.msk.f32.mxu0 %vm169_vm1, %v1345_v40  ;;  %v1340_v42 = vpop.permute.xlu1 %1339 }
 0x9f0   :  { %3486 = vmatmul.mubr.msk.f32.vlgmr.msra.gmra.mxu0 %vm169_vm1, %v1346_v41  ;;  %v1348_v45 = vsel %vm71_vm0, %v3440_v9, %v1340_v42 }
 0x9f1   :  { %v1338_v43 = vpop.permute.xlu0 %1337 }
 0x9f2   :  { %v1347_v44 = vsel %vm71_vm0, %v1038_v30, %v1338_v43 }
 0x9f3   :  { %3488 = vmatprep.mubr.msk.f32.mxu0 %vm169_vm1, %v1347_v44 }
 0x9f4   :  { %3489 = vmatmul.mubr.msk.f32.gmra.mxu0 %vm169_vm1, %v1348_v45 }
 0xab0   :  { %v3487_v50 = vpop.f32.mrf.mxu0 }
 0xab1   :  { %v1443_v62 = vadd.f32 %v3487_v50, %v1358_v61 }
 0xab2   :  { %v1437_v0 = vpop.f32.mrf.mxu0 }
 0xab3   :  { %v1438_v59 = vadd.f32 %v1437_v0, %v1358_v61  ;;  %v4327_v54 = vadd.f32 %v1443_v62, %v4108_v23  ;;  %v1616_v23 = vld [vmem:[%s4715_s5 + $0x70] sm:$0xff] }
 0xab4   :  { %v3490_v51 = vpop.f32.mrf.mxu0 }
 0xab5   :  { %v4324_v52 = vadd.f32 %v1438_v59, %v4106_v21  ;;  %v1453_v55 = vadd.f32 %v3490_v51, %v1358_v61  ;;  %v1617_v21 = vld [vmem:[%s4715_s5 + $0x78] sm:$0xff] }
 0xab6   :  { %v1447_v56 = vpop.f32.mrf.mxu0  ;;  %3513 = vmatprep.subr.mxu0 %v1617_v21 }
 0xab7   :  { %v1448_v57 = vadd.f32 %v1447_v56, %v1358_v61  ;;  %3507 = vmatprep.mubr.msk.f32.mxu1 %vm169_vm1, %v4324_v52  ;;  %v4337_v60 = vadd.f32 %v1453_v55, %v4114_v27  ;;  %3514 = vmatpush3.msra.mxu0 %v1617_v21  ;;  %v1614_v27 = vld [vmem:[%s4715_s5 + $0x60] sm:$0xff] }
 0xab8   :  { %3508 = vmatmul.mubr.msk.f32.vlgmr.msra.gmra.mxu1 %vm169_vm1, %v4327_v54  ;;  %3515 = vmatprep.subr.mxu0 %v1616_v23 }
 0xab9   :  { %v4334_v58 = vadd.f32 %v1448_v57, %v4112_v26  ;;  %3516 = vmatpush3.msra.mxu0 %v1616_v23  ;;  %v1615_v26 = vld [vmem:[%s4715_s5 + $0x68] sm:$0xff] }
 0xaba   :  { %3517 = vmatprep.subr.mxu0 %v1615_v26 }
 0xabb   :  { %3510 = vmatprep.mubr.msk.f32.mxu1 %vm169_vm1, %v4334_v58  ;;  %3518 = vmatpush3.msra.mxu0 %v1615_v26 }
 0xabc   :  { %3511 = vmatmul.mubr.msk.f32.gmra.mxu1 %vm169_vm1, %v4337_v60  ;;  %3519 = vmatprep.subr.mxu0 %v1614_v27 }
 0xabd   :  { %1870 = vmatprep.mubr.f32.mxu1 %v3898_v4  ;;  %3520 = vmatpush3.msra.mxu0 %v1614_v27 }
 0xabe   :  { %3521 = vmatprep.subr.mxu0 %v1613_v63 }
 0xabf   :  { %3522 = vmatpush3.msra.mxu0 %v1613_v63 }
 0xac0   :  { %3523 = vmatprep.subr.mxu0 %v1612_v1 }
 0xac1   :  { %3524 = vmatpush3.msra.mxu0 %v1612_v1 }
 0xac2   :  { %3525 = vmatprep.subr.mxu0 %v1611_v3 }
 0xac3   :  { %3526 = vmatpush3.msra.mxu0 %v1611_v3 }
 0xac4   :  { %3527 = vmatprep.subr.mxu0 %v1610_v6 }
 0xac5   :  { %3528 = vmatpush3.msra.mxu0 %v1610_v6 }
 0xac6   :  { %3529 = vmatprep.subr.mxu0 %v1609_v8 }
 0xac7   :  { %3530 = vmatpush3.msra.mxu0 %v1609_v8 }
 0xac8   :  { %3531 = vmatprep.subr.mxu0 %v1608_v11 }
 0xac9   :  { %3532 = vmatpush3.msra.mxu0 %v1608_v11 }
 0xaca   :  { %3533 = vmatprep.subr.mxu0 %v1607_v12 }
 0xacb   :  { %3534 = vmatpush3.msra.mxu0 %v1607_v12  ;;  %v1707_v12 = vld [vmem:[%s4716_s6 + $0x7] ss:$0 sm:$0xff] }
 0xacc   :  { %3535 = vmatprep.subr.mxu0 %v1606_v14 }
 0xacd   :  { %3536 = vmatpush3.msra.mxu0 %v1606_v14 }
 0xace   :  { %3537 = vmatprep.subr.mxu0 %v1605_v15 }
 0xacf   :  { %3538 = vmatpush3.msra.mxu0 %v1605_v15 }
 0xad0   :  { %3539 = vmatprep.subr.mxu0 %v1604_v16 }
 0xad1   :  { %3540 = vmatpush3.msra.mxu0 %v1604_v16 }
 0xad2   :  { %3541 = vmatprep.subr.mxu0 %v1603_v18 }
 0xad3   :  { %3542 = vmatpush3.msra.mxu0 %v1603_v18 }
 0xad4   :  { %3543 = vmatprep.subr.mxu0 %v1602_v19 }
 0xad5   :  { %3544 = vmatpush3.msra.mxu0 %v1602_v19 }
 0xb78   :  { %v3509_v5 = vpop.f32.mrf.mxu1 }
 0xb79   :  { %v1553_v22 = vadd.f32 %v3509_v5, %v1468_v20 }
 0xb7a   :  { %v1547_v2 = vpop.f32.mrf.mxu1 }
 0xb7b   :  { %v1571_v24 = vmul.f32 0.044715, %v1553_v22  ;;  %v1548_v9 = vadd.f32 %v1547_v2, %v1468_v20  ;;  %v1567_v57 = vmul.f32 0.5, %v1553_v22 }
 0xb7c   :  { %v3512_v25 = vpop.f32.mrf.mxu1 }
 0xb7d   :  { %v1575_v29 = vmul.f32 %v1571_v24, %v1553_v22  ;;  %v1570_v30 = vmul.f32 0.044715, %v1548_v9  ;;  %v1563_v7 = vadd.f32 %v3512_v25, %v1468_v20  ;;  %v1566_v51 = vmul.f32 0.5, %v1548_v9 }
 0xb7e   :  { %v1557_v31 = vpop.f32.mrf.mxu1 }
 0xb7f   :  { %v1579_v32 = vmul.f32 %v1575_v29, %v1553_v22  ;;  %v1574_v35 = vmul.f32 %v1570_v30, %v1548_v9  ;;  %v1573_v36 = vmul.f32 0.044715, %v1563_v7  ;;  %v1558_v37 = vadd.f32 %v1557_v31, %v1468_v20 }
 0xb80   :  { %v1569_v3 = vmul.f32 0.5, %v1563_v7 }
 0xb81   :  { %v1583_v38 = vadd.f32 %v1579_v32, %v1553_v22  ;;  %v1577_v39 = vmul.f32 %v1573_v36, %v1563_v7  ;;  %v1572_v40 = vmul.f32 0.044715, %v1558_v37  ;;  %v1578_v41 = vmul.f32 %v1574_v35, %v1548_v9 }
 0xb82   :  { %v1568_v63 = vmul.f32 0.5, %v1558_v37 }
 0xb83   :  { %v1587_v42 = vmul.f32 0.7978846, %v1583_v38  ;;  %v1576_v43 = vmul.f32 %v1572_v40, %v1558_v37  ;;  %v1582_v44 = vadd.f32 %v1578_v41, %v1548_v9  ;;  %v1581_v45 = vmul.f32 %v1577_v39, %v1563_v7 }
 0xb85   :  { %3770 = vtanh.f32 %v1587_v42  ;;  %v1586_v46 = vmul.f32 0.7978846, %v1582_v44  ;;  %v1580_v47 = vmul.f32 %v1576_v43, %v1558_v37  ;;  %v1585_v48 = vadd.f32 %v1581_v45, %v1563_v7 }
 0xb87   :  { %3772 = vtanh.f32 %v1586_v46  ;;  %v1584_v49 = vadd.f32 %v1580_v47, %v1558_v37  ;;  %v1589_v61 = vmul.f32 0.7978846, %v1585_v48 }
 0xb89   :  { %v1588_v50 = vmul.f32 0.7978846, %v1584_v49  ;;  %3774 = vtanh.f32 %v1589_v61  ;;  %v1780_v49 = vld [vmem:[#allocation2 + $0xf8] sm:$0xff]  ;;  %v1779_v61 = vld [vmem:[#allocation2 + $0xf0] sm:$0xff] }
 0xb8a   :  { %1822 = vmatprep.subr.mxu1 %v1780_v49 }
 0xb8b   :  { %3776 = vtanh.f32 %v1588_v50  ;;  %1823 = vmatpush1.msra.mxu1 %v1779_v61  ;;  %v1778_v50 = vld [vmem:[#allocation2 + $0xe8] sm:$0xff] }
 0xb8c   :  { %1824 = vmatprep.subr.mxu1 %v1778_v50 }
 0xb92   :  { %v3771_v62 = vpop.eup %3770 }
 0xb93   :  { %v1595_v59 = vadd.f32 1.0, %v3771_v62  ;;  %v1777_v62 = vld [vmem:[#allocation2 + $0xe0] sm:$0xff] }
 0xb94   :  { %v3773_v0 = vpop.eup %3772  ;;  %1825 = vmatpush1.msra.mxu1 %v1777_v62 }
 0xb95   :  { %v1594_v55 = vadd.f32 1.0, %v3773_v0  ;;  %v1599_v26 = vmul.f32 %v1595_v59, %v1567_v57  ;;  %v1776_v0 = vld [vmem:[#allocation2 + $0xd8] sm:$0xff]  ;;  %v1775_v59 = vld [vmem:[#allocation2 + $0xd0] sm:$0xff] }
 0xb96   :  { %v3775_v56 = vpop.eup %3774  ;;  %1826 = vmatprep.subr.mxu1 %v1776_v0  ;;  %v1771_v57 = vld [vmem:[#allocation2 + $0xb0] sm:$0xff] }
 0xb97   :  { %v1598_v21 = vmul.f32 %v1594_v55, %v1566_v51  ;;  %v1597_v27 = vadd.f32 1.0, %v3775_v56  ;;  %1827 = vmatpush1.msra.mxu1 %v1775_v59  ;;  %v1774_v51 = vld [vmem:[#allocation2 + $0xc8] sm:$0xff]  ;;  %v1773_v55 = vld [vmem:[#allocation2 + $0xc0] sm:$0xff]  ;;  %v1772_v56 = vld [vmem:[#allocation2 + $0xb8] sm:$0xff] }
 0xb98   :  { %v3777_v23 = vpop.eup %3776  ;;  %1828 = vmatprep.subr.mxu1 %v1774_v51 }
 0xb99   :  { %3545 = vmatprep.mubr.f32.mxu0 %v1598_v21  ;;  %v1596_v1 = vadd.f32 1.0, %v3777_v23  ;;  %v1601_v8 = vmul.f32 %v1597_v27, %v1569_v3  ;;  %1829 = vmatpush1.msra.mxu1 %v1773_v55  ;;  %v1770_v21 = vld [vmem:[#allocation2 + $0xa8] sm:$0xff]  ;;  %v1769_v23 = vld [vmem:[#allocation2 + $0xa0] sm:$0xff]  ;;  %v1767_v27 = vld [vmem:[#allocation2 + $0x90] sm:$0xff] }
 0xb9a   :  { %3546 = vmatmul.mubr.f32.vlgmr.msra.gmra.mxu0 %v1599_v26  ;;  %1830 = vmatprep.subr.mxu1 %v1772_v56  ;;  %v1768_v26 = vld [vmem:[#allocation2 + $0x98] sm:$0xff] }
 0xb9b   :  { %v1600_v6 = vmul.f32 %v1596_v1, %v1568_v63  ;;  %1831 = vmatpush1.msra.mxu1 %v1771_v57  ;;  %v1766_v63 = vld [vmem:[#allocation2 + $0x88] sm:$0xff]  ;;  %v1765_v1 = vld [vmem:[#allocation2 + $0x80] sm:$0xff] }
 0xb9c   :  { %1832 = vmatprep.subr.mxu1 %v1770_v21 }
 0xb9d   :  { %3548 = vmatprep.mubr.f32.mxu0 %v1600_v6  ;;  %1833 = vmatpush1.msra.mxu1 %v1769_v23 }
 0xb9e   :  { %3549 = vmatmul.mubr.f32.gmra.mxu0 %v1601_v8  ;;  %1834 = vmatprep.subr.mxu1 %v1768_v26 }
 0xb9f   :  { %1835 = vmatpush1.msra.mxu1 %v1767_v27 }
 0xba0   :  { %1836 = vmatprep.subr.mxu1 %v1766_v63 }
 0xba1   :  { %1837 = vmatpush1.msra.mxu1 %v1765_v1 }
 0xc5a   :  { %v3547_v11 = vpop.f32.mrf.mxu0 }
 0xc5b   :  { %v1704_v14 = vadd.f32 %v3547_v11, %v4327_v54 }
 0xc5c   :  { %v1684_v15 = vpop.f32.mrf.mxu0 }
 0xc5d   :  { %v4399_v16 = vadd.f32 %v1707_v12, %v1704_v14  ;;  %v1703_v18 = vadd.f32 %v1684_v15, %v4324_v52 }
 0xc5e   :  { %v3550_v19 = vpop.f32.mrf.mxu0 }
 0xc5f   :  { %v4402_v20 = vadd.f32 %v1707_v12, %v1703_v18  ;;  %v1715_v5 = vsel %vm169_vm1, %v4399_v16, 0.0  ;;  %v1706_v2 = vadd.f32 %v3550_v19, %v4337_v60 }
 0xc60   :  { %1716 = vadd.xlane.f32.xlu1 %v1715_v5  ;;  %v1694_v22 = vpop.f32.mrf.mxu0 }
 0xc61   :  { %v1705_v24 = vadd.f32 %v1694_v22, %v4334_v58  ;;  %v1712_v54 = vsel %vm169_vm1, %v4402_v20, 0.0  ;;  %v4412_v25 = vadd.f32 %v1707_v12, %v1706_v2 }
 0xc62   :  { %1713 = vadd.xlane.f32.xlu0 %v1712_v54 }
 0xc63   :  { %v4410_v9 = vadd.f32 %v1707_v12, %v1705_v24  ;;  %v1721_v29 = vsel %vm169_vm1, %v4412_v25, 0.0 }
 0xc65   :  { %v1718_v52 = vsel %vm169_vm1, %v4410_v9, 0.0 }
 0xc66   :  { %1719 = vadd.xlane.f32.xlu0 %v1718_v52 }
 0xc6a   :  { %1722 = vadd.xlane.f32.xlu0 %v1721_v29 }
 0xce9   :  { %v1717_v30 = vpop.xlane.xlu1 %1716 }
 0xcea   :  { %v1725_v60 = vmul.f32 0.015625, %v1717_v30 }
 0xceb   :  { %v1714_v7 = vpop.xlane.xlu0 %1713 }
 0xcec   :  { %v4419_v58 = vsub.f32 %v4399_v16, %v1725_v60  ;;  %v1724_v31 = vmul.f32 0.015625, %v1714_v7 }
 0xcee   :  { %v4422_v32 = vsub.f32 %v4402_v20, %v1724_v31  ;;  %v1733_v35 = vmul.f32 %v4419_v58, %v4419_v58 }
 0xcef   :  { %v1720_v36 = vpop.xlane.xlu0 %1719 }
 0xcf0   :  { %v1726_v37 = vmul.f32 0.015625, %v1720_v36  ;;  %v1739_v38 = vsel %vm169_vm1, %v1733_v35, 0.0  ;;  %v1732_v39 = vmul.f32 %v4422_v32, %v4422_v32 }
 0xcf1   :  { %1740 = vadd.xlane.f32.xlu1 %v1739_v38 }
 0xcf2   :  { %v4430_v40 = vsub.f32 %v4410_v9, %v1726_v37  ;;  %v1736_v41 = vsel %vm169_vm1, %v1732_v39, 0.0 }
 0xcf3   :  { %1737 = vadd.xlane.f32.xlu0 %v1736_v41  ;;  %v1723_v42 = vpop.xlane.xlu0 %1722 }
 0xcf4   :  { %v1727_v43 = vmul.f32 0.015625, %v1723_v42  ;;  %v1734_v44 = vmul.f32 %v4430_v40, %v4430_v40 }
 0xcf6   :  { %v4436_v45 = vsub.f32 %v4412_v25, %v1727_v43  ;;  %v1742_v46 = vsel %vm169_vm1, %v1734_v44, 0.0 }
 0xcf7   :  { %1743 = vadd.xlane.f32.xlu0 %v1742_v46 }
 0xcf8   :  { %v1735_v47 = vmul.f32 %v4436_v45, %v4436_v45 }
 0xcfa   :  { %v1745_v48 = vsel %vm169_vm1, %v1735_v47, 0.0 }
 0xcfb   :  { %1746 = vadd.xlane.f32.xlu1 %v1745_v48 }
 0xd7a   :  { %v1741_v3 = vpop.xlane.xlu1 %1740 }
 0xd7b   :  { %v1749_v6 = vmul.f32 0.015625, %v1741_v3 }
 0xd7c   :  { %v1738_v8 = vpop.xlane.xlu0 %1737 }
 0xd7d   :  { %v1748_v11 = vmul.f32 0.015625, %v1738_v8  ;;  %v1753_v12 = vadd.f32 1e-05, %v1749_v6 }
 0xd7f   :  { %v1752_v14 = vadd.f32 1e-05, %v1748_v11 }
 0xd80   :  { %v1744_v15 = vpop.xlane.xlu0 %1743 }
 0xd81   :  { %3778 = vrsqrt.f32 %v1752_v14  ;;  %v1750_v18 = vmul.f32 0.015625, %v1744_v15 }
 0xd82   :  { %3780 = vrsqrt.f32 %v1753_v12 }
 0xd83   :  { %v1754_v19 = vadd.f32 1e-05, %v1750_v18 }
 0xd84   :  { %v1747_v5 = vpop.xlane.xlu1 %1746 }
 0xd85   :  { %v1751_v22 = vmul.f32 0.015625, %v1747_v5  ;;  %3782 = vrsqrt.f32 %v1754_v19 }
 0xd87   :  { %v1755_v2 = vadd.f32 1e-05, %v1751_v22 }
 0xd89   :  { %3784 = vrsqrt.f32 %v1755_v2 }
 0xd8e   :  { %v3779_v24 = vpop.eup %3778 }
 0xd8f   :  { %v1760_v54 = vmul.f32 %v3779_v24, %v4422_v32  ;;  %v3781_v52 = vpop.eup %3780 }
 0xd90   :  { %v1761_v29 = vmul.f32 %v3781_v52, %v4419_v58  ;;  %v3030_v58 = vld [vmem:[%s4716_s6 + $0x10] ss:$8 sm:$0x3] }
 0xd91   :  { %3031 = vmatmul.mubr.msk.f32.vlgmr.msra.gmra.mxu1 %vm169_vm1, %v1760_v54  ;;  %v1787_v32 = vrot.slane %v3030_v58, %v676_v34  ;;  %v1791_v43 = vrot.slane %v3030_v58, %v680_v53 }
 0xd92   :  { %1876 = vmatprep.mubr.f32.mxu1 %v3898_v4  ;;  %v3783_v30 = vpop.eup %3782 }
 0xd93   :  { %v1762_v60 = vmul.f32 %v3783_v30, %v4430_v40 }
 0xd95   :  { %3032 = vmatmul.mubr.msk.f32.gmra.mxu1 %vm169_vm1, %v1761_v29 }
 0xd96   :  { %1882 = vmatprep.mubr.f32.mxu1 %v3898_v4  ;;  %v3785_v7 = vpop.eup %3784 }
 0xd97   :  { %v1763_v31 = vmul.f32 %v3785_v7, %v4436_v45 }
 0xd99   :  { %3033 = vmatmul.mubr.msk.f32.gmra.mxu1 %vm169_vm1, %v1762_v60 }
 0xd9a   :  { %1888 = vmatprep.mubr.f32.mxu1 %v3898_v4 }
 0xd9d   :  { %3034 = vmatmul.mubr.msk.f32.gmra.mxu1 %vm169_vm1, %v1763_v31 }
 0xe51   :  { %v1872_v35 = vpop.f32.mrf.mxu1 }
 0xe52   :  { %v1873_v36 = vadd.f32 %v1872_v35, %v1787_v32 }
 0xe53   :  { %v1874_v37 = vpop.f32.mrf.mxu1 }
 0xe54   :  { %3559 = vmatprep.mubr.msk.f32.mxu1 %vm71_vm0, %v1873_v36  ;;  %v4476_v33 = vadd.f32 %v1874_v37, %v1791_v43 }
 0xe55   :  { %v1878_v38 = vpop.f32.mrf.mxu1 }
 0xe56   :  { %v1879_v44 = vadd.f32 %v1878_v38, %v1787_v32 }
 0xe57   :  { %v1880_v39 = vpop.f32.mrf.mxu1 }
 0xe58   :  { %v4470_v48 = vadd.f32 %v1880_v39, %v1791_v43 }
 0xe59   :  { %v1884_v40 = vpop.f32.mrf.mxu1 }
 0xe5a   :  { %v1885_v4 = vadd.f32 %v1884_v40, %v1787_v32 }
 0xe5b   :  { %v1886_v41 = vpop.f32.mrf.mxu1 }
 0xe5c   :  { %1903 = vrot.lane.b32.xlu1 %v1885_v4, %s3899_s4  ;;  %v4466_v47 = vadd.f32 %v1886_v41, %v1791_v43 }
 0xe5d   :  { %v1890_v42 = vpop.f32.mrf.mxu1 }
 0xe5e   :  { %v1891_v45 = vadd.f32 %v1890_v42, %v1787_v32 }
 0xe5f   :  { %v1892_v46 = vpop.f32.mrf.mxu1 }
 0xe60   :  { %v4462_v34 = vadd.f32 %v1892_v46, %v1791_v43  ;;  %1905 = vrot.lane.b32.xlu0 %v1891_v45, %s3899_s4  ;;  %1901 = vrot.lane.b32.xlu1 %v1879_v44, %s3899_s4 }
 0xe62   :  { %3565 = vmatprep.subr.mxu0 %v4462_v34 }
 0xe63   :  { %3566 = vmatpush3.msra.mxu0 %v4462_v34 }
 0xe64   :  { %2171 = vrot.lane.b32.xlu0 %v1891_v45, %s3900_s20  ;;  %3567 = vmatprep.subr.mxu0 %v4466_v47 }
 0xe65   :  { %1899 = vrot.lane.b32.xlu1 %v1873_v36, %s3899_s4  ;;  %3568 = vmatpush3.msra.mxu0 %v4466_v47 }
 0xe66   :  { %3569 = vmatprep.subr.mxu0 %v4470_v48 }
 0xe67   :  { %3570 = vmatpush3.msra.mxu0 %v4470_v48 }
 0xe68   :  { %2167 = vrot.lane.b32.xlu0 %v1879_v44, %s3900_s20  ;;  %3571 = vmatprep.subr.mxu0 %v4476_v33 }
 0xe69   :  { %2169 = vrot.lane.b32.xlu1 %v1885_v4, %s3900_s20  ;;  %3572 = vmatpush3.msra.mxu0 %v4476_v33 }
 0xe6c   :  { %2157 = vrot.lane.b32.xlu0 %v1873_v36, %s3901_s21 }
 0xe6d   :  { %2165 = vrot.lane.b32.xlu1 %v1873_v36, %s3900_s20 }
 0xe70   :  { %2161 = vrot.lane.b32.xlu0 %v1885_v4, %s3901_s21 }
 0xe71   :  { %2159 = vrot.lane.b32.xlu1 %v1879_v44, %s3901_s21 }
 0xe75   :  { %2163 = vrot.lane.b32.xlu1 %v1891_v45, %s3901_s21 }
 0xece   :  { %v1904_v53 = vpop.permute.xlu1 %1903 }
 0xed2   :  { %v1906_v49 = vpop.permute.xlu0 %1905  ;;  %v1902_v61 = vpop.permute.xlu1 %1901 }
 0xed3   :  { %3551 = vmatprep.subr.msk.mxu1 %vm71_vm0, %v1906_v49 }
 0xed4   :  { %3552 = vmatpush3.xpose.msk.msra.mxu1 %vm71_vm0, %v1906_v49 }
 0xed5   :  { %3553 = vmatprep.subr.msk.mxu1 %vm71_vm0, %v1904_v53 }
 0xed6   :  { %v2172_v50 = vpop.permute.xlu0 %2171 }
 0xed7   :  { %v1900_v62 = vpop.permute.xlu1 %1899 }
 0xed8   :  { %3554 = vmatpush3.xpose.msk.msra.mxu1 %vm71_vm0, %v1904_v53 }
 0xed9   :  { %3555 = vmatprep.subr.msk.mxu1 %vm71_vm0, %v1902_v61 }
 0xeda   :  { %v2168_v0 = vpop.permute.xlu0 %2167 }
 0xedb   :  { %v2170_v59 = vpop.permute.xlu1 %2169 }
 0xedc   :  { %3556 = vmatpush3.xpose.msk.msra.mxu1 %vm71_vm0, %v1902_v61 }
 0xedd   :  { %3557 = vmatprep.subr.msk.mxu1 %vm71_vm0, %v1900_v62 }
 0xede   :  { %v2158_v51 = vpop.permute.xlu0 %2157 }
 0xedf   :  { %v2166_v55 = vpop.permute.xlu1 %2165 }
 0xee0   :  { %3558 = vmatpush3.xpose.msk.msra.mxu1 %vm71_vm0, %v1900_v62 }
 0xee1   :  { %3579 = vmatprep.subr.msk.mxu1 %vm71_vm0, %v2172_v50 }
 0xee2   :  { %v2162_v57 = vpop.permute.xlu0 %2161 }
 0xee3   :  { %3560 = vmatmul.mubr.msk.f32.vlgmr.msra.gmra.mxu1 %vm71_vm0, %v1879_v44  ;;  %v2160_v56 = vpop.permute.xlu1 %2159 }
 0xee4   :  { %3562 = vmatprep.mubr.msk.f32.mxu1 %vm71_vm0, %v1885_v4  ;;  %3580 = vmatpush3.xpose.msk.msra.mxu1 %vm71_vm0, %v2172_v50 }
 0xee5   :  { %3581 = vmatprep.subr.msk.mxu1 %vm71_vm0, %v2170_v59 }
 0xee7   :  { %3563 = vmatmul.mubr.msk.f32.gmra.mxu1 %vm71_vm0, %v1891_v45  ;;  %v2164_v21 = vpop.permute.xlu1 %2163 }
 0xee8   :  { %3582 = vmatpush3.xpose.msk.msra.mxu1 %vm71_vm0, %v2170_v59  ;;  %3587 = vmatprep.mubr.msk.f32.mxu1 %vm71_vm0, %v2158_v51 }
 0xee9   :  { %3583 = vmatprep.subr.msk.mxu1 %vm71_vm0, %v2168_v0 }
 0xeec   :  { %3584 = vmatpush3.xpose.msk.msra.mxu1 %vm71_vm0, %v2168_v0 }
 0xeed   :  { %3585 = vmatprep.subr.msk.mxu1 %vm71_vm0, %v2166_v55 }
 0xef0   :  { %3586 = vmatpush3.xpose.msk.msra.mxu1 %vm71_vm0, %v2166_v55 }
 0xef3   :  { %3588 = vmatmul.mubr.msk.f32.vlgmr.msra.gmra.mxu1 %vm71_vm0, %v2160_v56 }
 0xef4   :  { %3590 = vmatprep.mubr.msk.f32.mxu1 %vm71_vm0, %v2162_v57 }
 0xef7   :  { %3591 = vmatmul.mubr.msk.f32.gmra.mxu1 %vm71_vm0, %v2164_v21 }
 0xfa3   :  { %v3561_v23 = vpop.f32.mrf.mxu1 }
 0xfa4   :  { %v2009_v26 = vmul.f32 0.17677669, %v3561_v23 }
 0xfa5   :  { %v1989_v27 = vpop.f32.mrf.mxu1 }
 0xfa6   :  { %v2008_v63 = vmul.f32 0.17677669, %v1989_v27  ;;  %v2013_v1 = vadd.f32 %v2009_v26, %v4226_v10 }
 0xfa7   :  { %v3564_v3 = vpop.f32.mrf.mxu1 }
 0xfa8   :  { %v2011_v6 = vmul.f32 0.17677669, %v3564_v3  ;;  %v2019_v8 = vsel %vm71_vm0, %v2013_v1, -inf  ;;  %v2012_v11 = vadd.f32 %v2008_v63, %v4229_v13 }
 0xfa9   :  { %2020 = vmax.xlane.f32.xlu1 %v2019_v8  ;;  %v1999_v12 = vpop.f32.mrf.mxu1 }
 0xfaa   :  { %v2010_v14 = vmul.f32 0.17677669, %v1999_v12  ;;  %v2016_v15 = vsel %vm71_vm0, %v2012_v11, -inf  ;;  %v2015_v18 = vadd.f32 %v2011_v6, %v4232_v17 }
 0xfab   :  { %2017 = vmax.xlane.f32.xlu0 %v2016_v15 }
 0xfac   :  { %v2025_v19 = vsel %vm71_vm0, %v2015_v18, -inf  ;;  %v2014_v5 = vadd.f32 %v2010_v14, %v4237_v28 }
 0xfae   :  { %v2022_v22 = vsel %vm71_vm0, %v2014_v5, -inf }
 0xfaf   :  { %2026 = vmax.xlane.f32.xlu0 %v2025_v19 }
 0xfb3   :  { %2023 = vmax.xlane.f32.xlu0 %v2022_v22  ;;  %v3589_v2 = vpop.f32.mrf.mxu1 }
 0xfb4   :  { %v2275_v24 = vmul.f32 0.17677669, %v3589_v2 }
 0xfb5   :  { %v2255_v54 = vpop.f32.mrf.mxu1 }
 0xfb6   :  { %v2274_v52 = vmul.f32 0.17677669, %v2255_v54  ;;  %v2279_v29 = vadd.f32 %v2275_v24, %v4226_v10 }
 0xfb7   :  { %v3592_v30 = vpop.f32.mrf.mxu1 }
 0xfb8   :  { %v2277_v60 = vmul.f32 0.17677669, %v3592_v30  ;;  %v2285_v7 = vsel %vm71_vm0, %v2279_v29, -inf  ;;  %v2278_v31 = vadd.f32 %v2274_v52, %v4229_v13 }
 0xfb9   :  { %2286 = vmax.xlane.f32.xlu1 %v2285_v7  ;;  %v2265_v58 = vpop.f32.mrf.mxu1 }
 0xfba   :  { %v2276_v32 = vmul.f32 0.17677669, %v2265_v58  ;;  %v2282_v35 = vsel %vm71_vm0, %v2278_v31, -inf  ;;  %v2281_v36 = vadd.f32 %v2277_v60, %v4232_v17 }
 0xfbb   :  { %2283 = vmax.xlane.f32.xlu0 %v2282_v35 }
 0xfbc   :  { %v2291_v37 = vsel %vm71_vm0, %v2281_v36, -inf  ;;  %v2280_v38 = vadd.f32 %v2276_v32, %v4237_v28 }
 0xfbd   :  { %2292 = vmax.xlane.f32.xlu1 %v2291_v37 }
 0xfbe   :  { %v2288_v10 = vsel %vm71_vm0, %v2280_v38, -inf }
 0xfbf   :  { %2289 = vmax.xlane.f32.xlu0 %v2288_v10 }
0x1032   :  { %v2021_v39 = vpop.xlane.xlu1 %2020 }
0x1033   :  { %v2029_v40 = vsub.f32 %v2013_v1, %v2021_v39 }
0x1034   :  { %v2018_v4 = vpop.xlane.xlu0 %2017 }
0x1035   :  { %v2034_v13 = vmul.f32 1.442695, %v2029_v40  ;;  %v2028_v41 = vsub.f32 %v2012_v11, %v2018_v4 }
0x1037   :  { %3786 = vpow2.f32 %v2034_v13  ;;  %v2032_v42 = vmul.f32 1.442695, %v2028_v41 }
0x1038   :  { %v2027_v43 = vpop.xlane.xlu0 %2026 }
0x1039   :  { %3788 = vpow2.f32 %v2032_v42  ;;  %v2031_v44 = vsub.f32 %v2015_v18, %v2027_v43 }
0x103b   :  { %v2038_v17 = vmul.f32 1.442695, %v2031_v44 }
0x103c   :  { %v2024_v45 = vpop.xlane.xlu0 %2023 }
0x103d   :  { %3790 = vpow2.f32 %v2038_v17  ;;  %v2030_v46 = vsub.f32 %v2014_v5, %v2024_v45  ;;  %v3066_v17 = vld [vmem:[%s4712_s2 + $0x138] sm:$0xff]  ;;  %v3065_v45 = vld [vmem:[%s4712_s2 + $0x130] sm:$0xff] }
0x103f   :  { %v2036_v53 = vmul.f32 1.442695, %v2030_v46  ;;  %v3064_v46 = vld [vmem:[%s4712_s2 + $0x128] sm:$0xff] }
0x1041   :  { %3792 = vpow2.f32 %v2036_v53  ;;  %v3063_v53 = vld [vmem:[%s4712_s2 + $0x120] sm:$0xff] }
0x1042   :  { %v2287_v28 = vpop.xlane.xlu1 %2286 }
0x1043   :  { %v2295_v49 = vsub.f32 %v2279_v29, %v2287_v28  ;;  %v3062_v28 = vld [vmem:[%s4712_s2 + $0x118] sm:$0xff] }
0x1044   :  { %v3787_v61 = vpop.eup %3786  ;;  %v2284_v50 = vpop.xlane.xlu0 %2283 }
0x1045   :  { %v2300_v62 = vmul.f32 1.442695, %v2295_v49  ;;  %v2294_v0 = vsub.f32 %v2278_v31, %v2284_v50  ;;  %v2043_v59 = vsel %vm71_vm0, %v3787_v61, 0.0  ;;  %v3061_v49 = vld [vmem:[%s4712_s2 + $0x110] sm:$0xff]  ;;  %v3060_v50 = vld [vmem:[%s4712_s2 + $0x108] sm:$0xff] }
0x1046   :  { %v3789_v51 = vpop.eup %3788  ;;  %2044 = vadd.xlane.f32.xlu1 %v2043_v59  ;;  %v2293_v55 = vpop.xlane.xlu1 %2292 }
0x1047   :  { %3794 = vpow2.f32 %v2300_v62  ;;  %v2298_v56 = vmul.f32 1.442695, %v2294_v0  ;;  %v2297_v57 = vsub.f32 %v2281_v36, %v2293_v55  ;;  %v2040_v21 = vsel %vm71_vm0, %v3789_v51, 0.0  ;;  %v3059_v62 = vld [vmem:[%s4712_s2 + $0x100] sm:$0xff]  ;;  %v2577_v55 = vld [vmem:[#allocation5 + $0x70] sm:$0xff] }
0x1048   :  { %2041 = vadd.xlane.f32.xlu0 %v2040_v21  ;;  %v2290_v23 = vpop.xlane.xlu0 %2289 }
0x1049   :  { %3796 = vpow2.f32 %v2298_v56  ;;  %v2304_v26 = vmul.f32 1.442695, %v2297_v57  ;;  %v2296_v27 = vsub.f32 %v2280_v38, %v2290_v23  ;;  %v2576_v57 = vld [vmem:[#allocation5 + $0x68] sm:$0xff]  ;;  %v2575_v23 = vld [vmem:[#allocation5 + $0x60] sm:$0xff] }
0x104a   :  { %v3791_v63 = vpop.eup %3790 }
0x104b   :  { %3798 = vpow2.f32 %v2304_v26  ;;  %v2302_v1 = vmul.f32 1.442695, %v2296_v27  ;;  %v2049_v3 = vsel %vm71_vm0, %v3791_v63, 0.0 }
0x104c   :  { %2050 = vadd.xlane.f32.xlu1 %v2049_v3 }
0x104d   :  { %3800 = vpow2.f32 %v2302_v1 }
0x104e   :  { %v3793_v6 = vpop.eup %3792 }
0x104f   :  { %v2046_v8 = vsel %vm71_vm0, %v3793_v6, 0.0 }
0x1050   :  { %2047 = vadd.xlane.f32.xlu0 %v2046_v8 }
0x1054   :  { %v3795_v11 = vpop.eup %3794 }
0x1055   :  { %v2309_v12 = vsel %vm71_vm0, %v3795_v11, 0.0 }
0x1056   :  { %v3797_v14 = vpop.eup %3796  ;;  %2310 = vadd.xlane.f32.xlu1 %v2309_v12 }
0x1057   :  { %v2306_v15 = vsel %vm71_vm0, %v3797_v14, 0.0 }
0x1058   :  { %v3799_v18 = vpop.eup %3798  ;;  %2307 = vadd.xlane.f32.xlu0 %v2306_v15 }
0x1059   :  { %v2315_v19 = vsel %vm71_vm0, %v3799_v18, 0.0 }
0x105a   :  { %v3801_v5 = vpop.eup %3800  ;;  %2316 = vadd.xlane.f32.xlu1 %v2315_v19  ;;  %v2573_v19 = vld [vmem:[#allocation5 + $0x50] sm:$0xff] }
0x105b   :  { %v2312_v22 = vsel %vm71_vm0, %v3801_v5, 0.0 }
0x105c   :  { %2313 = vadd.xlane.f32.xlu0 %v2312_v22  ;;  %v2571_v22 = vld [vmem:[#allocation5 + $0x40] sm:$0xff] }
0x106b   :  { %2334 = vrot.lane.b32.xlu1 %v4466_v47, %s3901_s21 }
0x106f   :  { %2332 = vrot.lane.b32.xlu1 %v4470_v48, %s3901_s21 }
0x1072   :  { %2336 = vrot.lane.b32.xlu0 %v4462_v34, %s3901_s21 }
0x1073   :  { %2330 = vrot.lane.b32.xlu1 %v4476_v33, %s3901_s21 }
0x10cf   :  { %v2045_v2 = vpop.xlane.xlu1 %2044 }
0x10d0   :  { %3802 = vrcp.f32 %v2045_v2  ;;  %v2468_v2 = vld [vmem:[%s4716_s6 + $0x11] ss:$0 sm:$0xff] }
0x10d1   :  { %v2042_v24 = vpop.xlane.xlu0 %2041 }
0x10d2   :  { %3804 = vrcp.f32 %v2042_v24 }
0x10d5   :  { %v2051_v54 = vpop.xlane.xlu1 %2050 }
0x10d6   :  { %3806 = vrcp.f32 %v2051_v54 }
0x10d9   :  { %v2048_v52 = vpop.xlane.xlu0 %2047 }
0x10da   :  { %3808 = vrcp.f32 %v2048_v52 }
0x10dd   :  { %v3803_v29 = vpop.eup %3802 }
0x10de   :  { %v2055_v7 = vmul.f32 %v3803_v29, %v3787_v61 }
0x10df   :  { %v3805_v30 = vpop.eup %3804  ;;  %v2311_v47 = vpop.xlane.xlu1 %2310 }
0x10e0   :  { %v2053_v60 = vmul.f32 %v3805_v30, %v3789_v51  ;;  %3810 = vrcp.f32 %v2311_v47  ;;  %v2578_v51 = vld [vmem:[#allocation5 + $0x78] sm:$0xff] }
0x10e1   :  { %v2308_v48 = vpop.xlane.xlu0 %2307  ;;  %3629 = vmatprep.subr.mxu1 %v2578_v51 }
0x10e2   :  { %3812 = vrcp.f32 %v2308_v48  ;;  %3573 = vmatprep.mubr.msk.f32.mxu0 %vm71_vm0, %v2053_v60  ;;  %3630 = vmatpush3.msra.mxu1 %v2578_v51 }
0x10e3   :  { %3574 = vmatmul.mubr.msk.f32.vlgmr.msra.gmra.mxu0 %vm71_vm0, %v2055_v7  ;;  %v2317_v34 = vpop.xlane.xlu1 %2316  ;;  %v3807_v31 = vpop.eup %3806  ;;  %3631 = vmatprep.subr.mxu1 %v2577_v55 }
0x10e4   :  { %3814 = vrcp.f32 %v2317_v34  ;;  %v2059_v37 = vmul.f32 %v3807_v31, %v3791_v63  ;;  %3632 = vmatpush3.msra.mxu1 %v2577_v55 }
0x10e5   :  { %v2314_v33 = vpop.xlane.xlu0 %2313  ;;  %3633 = vmatprep.subr.mxu1 %v2576_v57 }
0x10e6   :  { %3816 = vrcp.f32 %v2314_v33  ;;  %3634 = vmatpush3.msra.mxu1 %v2576_v57 }
0x10e7   :  { %v3809_v58 = vpop.eup %3808  ;;  %v2335_v32 = vpop.permute.xlu1 %2334  ;;  %3635 = vmatprep.subr.mxu1 %v2575_v23 }
0x10e8   :  { %v2057_v35 = vmul.f32 %v3809_v58, %v3793_v6  ;;  %3636 = vmatpush3.msra.mxu1 %v2575_v23  ;;  %v3086_v58 = vld [vmem:[%s4715_s5 + $0xd8] sm:$0xff] }
0x10e9   :  { %v2337_v36 = vpop.permute.xlu0 %2336 }
0x10ea   :  { %3576 = vmatprep.mubr.msk.f32.mxu0 %vm71_vm0, %v2057_v35  ;;  %3593 = vmatprep.subr.mxu0 %v2337_v36  ;;  %v3084_v35 = vld [vmem:[%s4715_s5 + $0xc8] sm:$0xff] }
0x10eb   :  { %3577 = vmatmul.mubr.msk.f32.gmra.mxu0 %vm71_vm0, %v2059_v37  ;;  %v2333_v38 = vpop.permute.xlu1 %2332  ;;  %v3082_v37 = vld [vmem:[%s4715_s5 + $0xb8] sm:$0xff] }
0x10ec   :  { %3594 = vmatpush3.msra.mxu0 %v2337_v36  ;;  %v3083_v36 = vld [vmem:[%s4715_s5 + $0xc0] sm:$0xff] }
0x10ed   :  { %3595 = vmatprep.subr.mxu0 %v2335_v32  ;;  %v3811_v10 = vpop.eup %3810 }
0x10ee   :  { %3596 = vmatpush3.msra.mxu0 %v2335_v32  ;;  %v2321_v13 = vmul.f32 %v3811_v10, %v3795_v11  ;;  %v3085_v32 = vld [vmem:[%s4715_s5 + $0xd0] sm:$0xff]  ;;  %v3080_v10 = vld [vmem:[%s4715_s5 + $0xa8] sm:$0xff] }
0x10ef   :  { %v3813_v39 = vpop.eup %3812  ;;  %3597 = vmatprep.subr.mxu0 %v2333_v38  ;;  %v2331_v40 = vpop.permute.xlu1 %2330 }
0x10f0   :  { %3598 = vmatpush3.msra.mxu0 %v2333_v38  ;;  %v2319_v4 = vmul.f32 %v3813_v39, %v3797_v14  ;;  %v3081_v38 = vld [vmem:[%s4715_s5 + $0xb0] sm:$0xff]  ;;  %v3079_v39 = vld [vmem:[%s4715_s5 + $0xa0] sm:$0xff] }
0x10f1   :  { %3599 = vmatprep.subr.mxu0 %v2331_v40  ;;  %v3815_v41 = vpop.eup %3814 }
0x10f2   :  { %3600 = vmatpush3.msra.mxu0 %v2331_v40  ;;  %3601 = vmatprep.mubr.msk.f32.mxu0 %vm71_vm0, %v2319_v4  ;;  %v2325_v44 = vmul.f32 %v3815_v41, %v3799_v18  ;;  %v2574_v18 = vld [vmem:[#allocation5 + $0x58] sm:$0xff]  ;;  %v3077_v4 = vld [vmem:[%s4715_s5 + $0x90] sm:$0xff]  ;;  %v3075_v41 = vld [vmem:[%s4715_s5 + $0x80] sm:$0xff] }
0x10f3   :  { %v3817_v42 = vpop.eup %3816  ;;  %3602 = vmatmul.mubr.msk.f32.vlgmr.msra.gmra.mxu0 %vm71_vm0, %v2321_v13  ;;  %3607 = vmatprep.subr.mxu0 %v3066_v17  ;;  %v3078_v40 = vld [vmem:[%s4715_s5 + $0x98] sm:$0xff]  ;;  %v3076_v13 = vld [vmem:[%s4715_s5 + $0x88] sm:$0xff] }
0x10f4   :  { %v2323_v43 = vmul.f32 %v3817_v42, %v3801_v5  ;;  %3608 = vmatpush3.msra.mxu0 %v3066_v17  ;;  %3637 = vmatprep.subr.mxu1 %v2574_v18  ;;  %v2572_v5 = vld [vmem:[#allocation5 + $0x48] sm:$0xff]  ;;  %v3098_v42 = vld [vmem:[%s4712_s2 + $0xb8] sm:$0xff]  ;;  %v3095_v17 = vld [vmem:[%s4712_s2 + $0xa0] sm:$0xff] }
0x10f5   :  { %3609 = vmatprep.subr.mxu0 %v3065_v45  ;;  %3638 = vmatpush3.msra.mxu1 %v2574_v18 }
0x10f6   :  { %3604 = vmatprep.mubr.msk.f32.mxu0 %vm71_vm0, %v2323_v43  ;;  %3610 = vmatpush3.msra.mxu0 %v3065_v45  ;;  %v3097_v43 = vld [vmem:[%s4712_s2 + $0xb0] sm:$0xff] }
0x10f7   :  { %3605 = vmatmul.mubr.msk.f32.gmra.mxu0 %vm71_vm0, %v2325_v44  ;;  %3611 = vmatprep.subr.mxu0 %v3064_v46  ;;  %v3096_v44 = vld [vmem:[%s4712_s2 + $0xa8] sm:$0xff]  ;;  %v2579_v45 = vld [vmem:[%s4716_s6 + $0x12] ss:$0 sm:$0xff] }
0x10f8   :  { %3612 = vmatpush3.msra.mxu0 %v3064_v46  ;;  %3639 = vmatprep.subr.mxu1 %v2573_v19 }
0x10f9   :  { %3613 = vmatprep.subr.mxu0 %v3063_v53  ;;  %3640 = vmatpush3.msra.mxu1 %v2573_v19 }
0x10fa   :  { %3614 = vmatpush3.msra.mxu0 %v3063_v53  ;;  %3641 = vmatprep.subr.mxu1 %v2572_v5 }
0x10fb   :  { %3615 = vmatprep.subr.mxu0 %v3062_v28  ;;  %3642 = vmatpush3.msra.mxu1 %v2572_v5 }
0x10fc   :  { %3616 = vmatpush3.msra.mxu0 %v3062_v28  ;;  %3643 = vmatprep.subr.mxu1 %v2571_v22 }
0x10fd   :  { %3617 = vmatprep.subr.mxu0 %v3061_v49  ;;  %3644 = vmatpush3.msra.mxu1 %v2571_v22 }
0x10fe   :  { %3618 = vmatpush3.msra.mxu0 %v3061_v49  ;;  %3689 = vmatprep.subr.mxu1 %v3098_v42 }
0x10ff   :  { %3619 = vmatprep.subr.mxu0 %v3060_v50 }
0x1100   :  { %3620 = vmatpush3.msra.mxu0 %v3060_v50 }
0x1101   :  { %3621 = vmatprep.subr.mxu0 %v3059_v62 }
0x1102   :  { %3622 = vmatpush3.msra.mxu0 %v3059_v62 }
0x11a3   :  { %v3575_v61 = vpop.f32.mrf.mxu0 }
0x11a5   :  { %v2138_v0 = vpop.f32.mrf.mxu0 }
0x11ab   :  { %v3578_v59 = vpop.f32.mrf.mxu0 }
0x11ad   :  { %v2148_v56 = vpop.f32.mrf.mxu0 }
0x11b3   :  { %v3603_v21 = vpop.f32.mrf.mxu0 }
0x11b4   :  { %2445 = vrot.lane.b32.xlu1 %v3603_v21, %s3900_s20 }
0x11b5   :  { %v2420_v26 = vpop.f32.mrf.mxu0 }
0x11b6   :  { %2443 = vrot.lane.b32.xlu0 %v2420_v26, %s3900_s20 }
0x11b7   :  { %v3606_v27 = vpop.f32.mrf.mxu0 }
0x11b8   :  { %2449 = vrot.lane.b32.xlu1 %v3606_v27, %s3900_s20 }
0x11b9   :  { %v2430_v63 = vpop.f32.mrf.mxu0 }
0x11ba   :  { %2447 = vrot.lane.b32.xlu0 %v2430_v63, %s3900_s20 }
0x1226   :  { %v2446_v1 = vpop.permute.xlu1 %2445 }
0x1227   :  { %v2456_v8 = vsel %vm71_vm0, %v3575_v61, %v2446_v1 }
0x1228   :  { %v2444_v3 = vpop.permute.xlu0 %2443 }
0x1229   :  { %v2455_v6 = vsel %vm71_vm0, %v2138_v0, %v2444_v3 }
0x122a   :  { %3623 = vmatprep.mubr.msk.f32.mxu0 %vm169_vm1, %v2455_v6  ;;  %v2450_v11 = vpop.permute.xlu1 %2449 }
0x122b   :  { %3624 = vmatmul.mubr.msk.f32.vlgmr.msra.gmra.mxu0 %vm169_vm1, %v2456_v8  ;;  %v2458_v15 = vsel %vm71_vm0, %v3578_v59, %v2450_v11 }
0x122c   :  { %v2448_v12 = vpop.permute.xlu0 %2447 }
0x122d   :  { %v2457_v14 = vsel %vm71_vm0, %v2148_v56, %v2448_v12 }
0x122e   :  { %3626 = vmatprep.mubr.msk.f32.mxu0 %vm169_vm1, %v2457_v14 }
0x122f   :  { %3627 = vmatmul.mubr.msk.f32.gmra.mxu0 %vm169_vm1, %v2458_v15 }
0x12eb   :  { %v3625_v24 = vpop.f32.mrf.mxu0 }
0x12ec   :  { %v2553_v54 = vadd.f32 %v3625_v24, %v2468_v2 }
0x12ed   :  { %v2547_v52 = vpop.f32.mrf.mxu0 }
0x12ee   :  { %v2548_v29 = vadd.f32 %v2547_v52, %v2468_v2  ;;  %v4595_v60 = vadd.f32 %v2553_v54, %v4399_v16  ;;  %v3090_v16 = vld [vmem:[%s4715_s5 + $0xf8] sm:$0xff] }
0x12ef   :  { %v3628_v30 = vpop.f32.mrf.mxu0  ;;  %3651 = vmatprep.subr.mxu0 %v3090_v16 }
0x12f0   :  { %v4592_v47 = vadd.f32 %v2548_v29, %v4402_v20  ;;  %v2563_v7 = vadd.f32 %v3628_v30, %v2468_v2  ;;  %3652 = vmatpush3.msra.mxu0 %v3090_v16  ;;  %v3089_v20 = vld [vmem:[%s4715_s5 + $0xf0] sm:$0xff] }
0x12f1   :  { %v2557_v48 = vpop.f32.mrf.mxu0  ;;  %3653 = vmatprep.subr.mxu0 %v3089_v20 }
0x12f2   :  { %v2558_v34 = vadd.f32 %v2557_v48, %v2468_v2  ;;  %3645 = vmatprep.mubr.msk.f32.mxu1 %vm169_vm1, %v4592_v47  ;;  %v4605_v31 = vadd.f32 %v2563_v7, %v4412_v25  ;;  %3654 = vmatpush3.msra.mxu0 %v3089_v20  ;;  %v3087_v25 = vld [vmem:[%s4715_s5 + $0xe0] sm:$0xff] }
0x12f3   :  { %3646 = vmatmul.mubr.msk.f32.vlgmr.msra.gmra.mxu1 %vm169_vm1, %v4595_v60 }
0x12f4   :  { %v4602_v33 = vadd.f32 %v2558_v34, %v4410_v9  ;;  %v3088_v9 = vld [vmem:[%s4715_s5 + $0xe8] sm:$0xff]  ;;  %3690 = vmatpush3.msra.mxu1 %v3098_v42 }
0x12f5   :  { %3655 = vmatprep.subr.mxu0 %v3088_v9  ;;  %3691 = vmatprep.subr.mxu1 %v3097_v43 }
0x12f6   :  { %3648 = vmatprep.mubr.msk.f32.mxu1 %vm169_vm1, %v4602_v33  ;;  %3656 = vmatpush3.msra.mxu0 %v3088_v9 }
0x12f7   :  { %3649 = vmatmul.mubr.msk.f32.gmra.mxu1 %vm169_vm1, %v4605_v31  ;;  %3657 = vmatprep.subr.mxu0 %v3087_v25 }
0x12f8   :  { %3658 = vmatpush3.msra.mxu0 %v3087_v25  ;;  %3692 = vmatpush3.msra.mxu1 %v3097_v43 }
0x12f9   :  { %3659 = vmatprep.subr.mxu0 %v3086_v58  ;;  %3693 = vmatprep.subr.mxu1 %v3096_v44 }
0x12fa   :  { %3660 = vmatpush3.msra.mxu0 %v3086_v58  ;;  %3694 = vmatpush3.msra.mxu1 %v3096_v44 }
0x12fb   :  { %3661 = vmatprep.subr.mxu0 %v3085_v32  ;;  %3695 = vmatprep.subr.mxu1 %v3095_v17 }
0x12fc   :  { %3662 = vmatpush3.msra.mxu0 %v3085_v32  ;;  %3696 = vmatpush3.msra.mxu1 %v3095_v17  ;;  %v3094_v32 = vld [vmem:[%s4712_s2 + $0x98] sm:$0xff] }
0x12fd   :  { %3663 = vmatprep.subr.mxu0 %v3084_v35  ;;  %3697 = vmatprep.subr.mxu1 %v3094_v32 }
0x12fe   :  { %3664 = vmatpush3.msra.mxu0 %v3084_v35  ;;  %3698 = vmatpush3.msra.mxu1 %v3094_v32  ;;  %v3093_v35 = vld [vmem:[%s4712_s2 + $0x90] sm:$0xff] }
0x12ff   :  { %3665 = vmatprep.subr.mxu0 %v3083_v36  ;;  %3699 = vmatprep.subr.mxu1 %v3093_v35 }
0x1300   :  { %3666 = vmatpush3.msra.mxu0 %v3083_v36  ;;  %3700 = vmatpush3.msra.mxu1 %v3093_v35  ;;  %v3092_v36 = vld [vmem:[%s4712_s2 + $0x88] sm:$0xff] }
0x1301   :  { %3667 = vmatprep.subr.mxu0 %v3082_v37  ;;  %3701 = vmatprep.subr.mxu1 %v3092_v36 }
0x1302   :  { %3668 = vmatpush3.msra.mxu0 %v3082_v37  ;;  %3702 = vmatpush3.msra.mxu1 %v3092_v36  ;;  %v3091_v37 = vld [vmem:[%s4712_s2 + $0x80] sm:$0xff] }
0x1303   :  { %3669 = vmatprep.subr.mxu0 %v3081_v38  ;;  %3703 = vmatprep.subr.mxu1 %v3091_v37 }
0x1304   :  { %3670 = vmatpush3.msra.mxu0 %v3081_v38  ;;  %3704 = vmatpush3.msra.mxu1 %v3091_v37 }
0x1305   :  { %3671 = vmatprep.subr.mxu0 %v3080_v10 }
0x1306   :  { %3672 = vmatpush3.msra.mxu0 %v3080_v10 }
0x1307   :  { %3673 = vmatprep.subr.mxu0 %v3079_v39 }
0x1308   :  { %3674 = vmatpush3.msra.mxu0 %v3079_v39 }
0x1309   :  { %3675 = vmatprep.subr.mxu0 %v3078_v40 }
0x130a   :  { %3676 = vmatpush3.msra.mxu0 %v3078_v40  ;;  %v2819_v40 = vld [vmem:[%s4716_s6 + $0x13] ss:$0 sm:$0xff] }
0x130b   :  { %3677 = vmatprep.subr.mxu0 %v3077_v4 }
0x130c   :  { %3678 = vmatpush3.msra.mxu0 %v3077_v4 }
0x130d   :  { %3679 = vmatprep.subr.mxu0 %v3076_v13 }
0x130e   :  { %3680 = vmatpush3.msra.mxu0 %v3076_v13 }
0x130f   :  { %3681 = vmatprep.subr.mxu0 %v3075_v41 }
0x1310   :  { %3682 = vmatpush3.msra.mxu0 %v3075_v41 }
0x13b3   :  { %v3647_v46 = vpop.f32.mrf.mxu1 }
0x13b4   :  { %v2664_v53 = vadd.f32 %v3647_v46, %v2579_v45 }
0x13b5   :  { %v2658_v28 = vpop.f32.mrf.mxu1 }
0x13b6   :  { %v2682_v49 = vmul.f32 0.044715, %v2664_v53  ;;  %v2659_v61 = vadd.f32 %v2658_v28, %v2579_v45  ;;  %v2678_v29 = vmul.f32 0.5, %v2664_v53 }
0x13b7   :  { %v3650_v50 = vpop.f32.mrf.mxu1 }
0x13b8   :  { %v2686_v62 = vmul.f32 %v2682_v49, %v2664_v53  ;;  %v2681_v0 = vmul.f32 0.044715, %v2659_v61  ;;  %v2674_v59 = vadd.f32 %v3650_v50, %v2579_v45  ;;  %v2677_v24 = vmul.f32 0.5, %v2659_v61 }
0x13b9   :  { %v2668_v51 = vpop.f32.mrf.mxu1 }
0x13ba   :  { %v2690_v55 = vmul.f32 %v2686_v62, %v2664_v53  ;;  %v2685_v56 = vmul.f32 %v2681_v0, %v2659_v61  ;;  %v2684_v57 = vmul.f32 0.044715, %v2674_v59  ;;  %v2669_v21 = vadd.f32 %v2668_v51, %v2579_v45 }
0x13bb   :  { %v2680_v9 = vmul.f32 0.5, %v2674_v59 }
0x13bc   :  { %v2694_v23 = vadd.f32 %v2690_v55, %v2664_v53  ;;  %v2688_v26 = vmul.f32 %v2684_v57, %v2674_v59  ;;  %v2683_v27 = vmul.f32 0.044715, %v2669_v21  ;;  %v2689_v63 = vmul.f32 %v2685_v56, %v2659_v61 }
0x13bd   :  { %v2679_v16 = vmul.f32 0.5, %v2669_v21 }
0x13be   :  { %v2698_v1 = vmul.f32 0.7978846, %v2694_v23  ;;  %v2687_v3 = vmul.f32 %v2683_v27, %v2669_v21  ;;  %v2693_v6 = vadd.f32 %v2689_v63, %v2659_v61  ;;  %v2692_v8 = vmul.f32 %v2688_v26, %v2674_v59 }
0x13c0   :  { %3818 = vtanh.f32 %v2698_v1  ;;  %v2697_v11 = vmul.f32 0.7978846, %v2693_v6  ;;  %v2691_v12 = vmul.f32 %v2687_v3, %v2669_v21  ;;  %v2696_v14 = vadd.f32 %v2692_v8, %v2674_v59 }
0x13c2   :  { %3820 = vtanh.f32 %v2697_v11  ;;  %v2695_v15 = vadd.f32 %v2691_v12, %v2669_v21  ;;  %v2700_v18 = vmul.f32 0.7978846, %v2696_v14 }
0x13c4   :  { %v2699_v19 = vmul.f32 0.7978846, %v2695_v15  ;;  %3822 = vtanh.f32 %v2700_v18 }
0x13c6   :  { %3824 = vtanh.f32 %v2699_v19 }
0x13cd   :  { %v3819_v5 = vpop.eup %3818 }
0x13ce   :  { %v2706_v2 = vadd.f32 1.0, %v3819_v5 }
0x13cf   :  { %v3821_v22 = vpop.eup %3820 }
0x13d0   :  { %v2705_v54 = vadd.f32 1.0, %v3821_v22  ;;  %v2710_v48 = vmul.f32 %v2706_v2, %v2678_v29 }
0x13d1   :  { %v3823_v52 = vpop.eup %3822 }
0x13d2   :  { %v2709_v30 = vmul.f32 %v2705_v54, %v2677_v24  ;;  %v2708_v34 = vadd.f32 1.0, %v3823_v52 }
0x13d3   :  { %v3825_v7 = vpop.eup %3824 }
0x13d4   :  { %3683 = vmatprep.mubr.f32.mxu0 %v2709_v30  ;;  %v2707_v20 = vadd.f32 1.0, %v3825_v7  ;;  %v2712_v58 = vmul.f32 %v2708_v34, %v2680_v9 }
0x13d5   :  { %3684 = vmatmul.mubr.f32.vlgmr.msra.gmra.mxu0 %v2710_v48 }
0x13d6   :  { %v2711_v25 = vmul.f32 %v2707_v20, %v2679_v16 }
0x13d8   :  { %3686 = vmatprep.mubr.f32.mxu0 %v2711_v25 }
0x13d9   :  { %3687 = vmatmul.mubr.f32.gmra.mxu0 %v2712_v58 }
0x1495   :  { %v3685_v38 = vpop.f32.mrf.mxu0 }
0x1496   :  { %v2816_v10 = vadd.f32 %v3685_v38, %v4595_v60 }
0x1497   :  { %v2796_v39 = vpop.f32.mrf.mxu0 }
0x1498   :  { %v2815_v4 = vadd.f32 %v2796_v39, %v4592_v47  ;;  %v2821_v42 = vadd.f32 %v2819_v40, %v2816_v10  ;;  %v2833_v47 = vld [vmem:[%s4716_s6 + $0x3] ss:$0 sm:$0xff]  ;;  %s3866_s6 = scalar_lea.vmem %s2941_s29, 512 }
0x1499   :  { %v3688_v13 = vpop.f32.mrf.mxu0  ;;  %p3867_p10 = scmp.ne.s32.totalorder %s2941_s29, %s3866_s6  ;;  %p3872_p12 = scmp.lt.s32.totalorder %s3866_s6, %s3866_s6 }
0x149a   :  { %v2820_v41 = vadd.f32 %v2819_v40, %v2815_v4  ;;  %v2818_v43 = vadd.f32 %v3688_v13, %v4605_v31 }
0x149b   :  { %v2806_v44 = vpop.f32.mrf.mxu0  ;;  %p3873_p13 = por %p3872_p12, %p3871_p11 }
0x149c   :  { %v2817_v17 = vadd.f32 %v2806_v44, %v4602_v33  ;;  %3705 = vmatprep.mubr.msk.f32.mxu1 %vm169_vm1, %v2820_v41  ;;  %v2823_v45 = vadd.f32 %v2819_v40, %v2818_v43 }
0x149d   :  { %3706 = vmatmul.mubr.msk.f32.vlgmr.msra.gmra.mxu1 %vm169_vm1, %v2821_v42  ;;  %p3874_p0 = pnand %p3873_p13, %p3867_p10 }
0x149e   :  { %v2822_v60 = vadd.f32 %v2819_v40, %v2817_v17 }
0x14a0   :  { %3708 = vmatprep.mubr.msk.f32.mxu1 %vm169_vm1, %v2822_v60 }
0x14a1   :  { %3709 = vmatmul.mubr.msk.f32.gmra.mxu1 %vm169_vm1, %v2823_v45 }
0x155d   :  { %v3707_v46 = vpop.f32.mrf.mxu1 }
0x155e   :  { %v2918_v53 = vadd.f32 %v3707_v46, %v2833_v47 }
0x155f   :  { %v2912_v31 = vpop.f32.mrf.mxu1 }
0x1560   :  { %2932 = vst.msk [vmem:[#allocation7 + $0x8] sm:$0xff] %vm169_vm1, %v2918_v53  ;;  %v2913_v33 = vadd.f32 %v2912_v31, %v2833_v47 }
0x1561   :  { %v3710_v28 = vpop.f32.mrf.mxu1 }
0x1562   :  { %2931 = vst.msk [vmem:[#allocation7] sm:$0xff] %vm169_vm1, %v2913_v33  ;;  %v2928_v49 = vadd.f32 %v3710_v28, %v2833_v47 }
0x1563   :  { %v2922_v61 = vpop.f32.mrf.mxu1 }
0x1564   :  { %2934 = vst.msk [vmem:[#allocation7 + $0x18] sm:$0xff] %vm169_vm1, %v2928_v49  ;;  %v2923_v50 = vadd.f32 %v2922_v61, %v2833_v47 }
0x1566   :  { %2933 = vst.msk [vmem:[#allocation7 + $0x10] sm:$0xff] %vm169_vm1, %v2923_v50 }
0x1567   :  { %3877 = shalt.err (!%p3874_p0)
}
0x1568   :  { %2946 = dma.vmem_to_hbm [thread:$0]  %s2941_s29, 512, %s4717_s7, [#allocation4], %s3896_s11, %s3896_s11, %s3897_s12  }
0x1569   :  { %3890 = dma.done.wait [#allocation4], 512  }
0x156a   :  { %3891 = vsyncadd [#allocation4], 4294966784 }
0x156b   :  { %2950 = vsyncpa [#allocation3], 1 }
0x156c   :  { %2951 = vsyncpa [#allocation6], 1 }
0x156d   :  { %2952 = vsyncpa [#allocation4], 1 }

</bundles_post_ra>
